<compile_context>
chip_gen: v7x
topology: tpu7x:2x2x1
jax: 0.10.0
libtpu: 0.0.40
codegen_flags: <defaults>
</compile_context>

<pallas_src>
import math
from functools import partial

import numpy as np
import jax
import jax.numpy as jnp
from jax import lax
from jax.experimental import pallas as pl
from jax.experimental.pallas import tpu as pltpu


def _round_up(x, m):
    return ((x + m - 1) // m) * m


def _dft_matrix(n, cols=None):
    """(n, cols) forward DFT matrix with 'ortho' normalisation (1/sqrt(n))."""
    cols = n if cols is None else cols
    idx = np.arange(n)[:, None] * np.arange(cols)[None, :]
    return np.exp(-2j * np.pi * idx / n) / np.sqrt(n)


def _kept_rows(n, high, low):
    """Frequency rows kept by the PyTorch truncation y[..., :high] ++ y[..., -low:],
    including the degenerate `-0:` == whole-axis quirk when low == 0."""
    rows = list(range(high))
    rows += list(range(n)) if low == 0 else list(range(n - low, n))
    return rows


def _rfft3_kernel(x_ref, fw_ref, fh_ref, fd_ref, o_ref, *, nb, d, h, kwp, lh, ld):
    """One grid step: nb (batch, channel) volumes -> truncated 3-D spectrum.

    x_ref : (nb*d*h, w)          real input rows, row index = (n, d, h) row-major
    fw_ref: (w, 2*kwp)           [Re | Im] of the truncated + lane-padded W rDFT
    fh_ref: (2*lh, h)            [Re ; Im] of the truncated + padded H DFT
    fd_ref: (2*ld, d)            [Re ; Im] of the truncated + padded D DFT
    o_ref : (nb, ld, lh, 2*kwp)  [Re | Im] of the truncated spectrum (lane-dense)
    """
    f32 = jnp.float32
    two_kwp = 2 * kwp

    # ---- stage 1: real -> complex rDFT along W (single fused MXU matmul) --------
    a = jnp.dot(x_ref[...], fw_ref[...], preferred_element_type=f32)   # (nb*d*h, 2*kwp)

    # ---- stage 2: complex DFT along H, batched over (n, d) ----------------------
    a3 = a.reshape(nb * d, h, two_kwp)
    fh = jnp.broadcast_to(fh_ref[...][None], (nb * d, 2 * lh, h))
    dn = (((2,), (1,)), ((0,), (0,)))            # contract H, batch over leading dim
    r = lax.dot_general(fh, a3, dn, preferred_element_type=f32)        # (nb*d, 2*lh, 2*kwp)
    p, q = r[:, :lh, :], r[:, lh:, :]            # Re(Fh)@[ar|ai]  and  Im(Fh)@[ar|ai]
    b = jnp.concatenate([p[..., :kwp] - q[..., kwp:],                  # real part
                         p[..., kwp:] + q[..., :kwp]], axis=-1)        # imag part

    # ---- stage 3: complex DFT along D, batched over (n, kh) ---------------------
    bt = jnp.transpose(b.reshape(nb, d, lh, two_kwp), (0, 2, 1, 3))    # (nb, lh, d, 2*kwp)
    b3 = bt.reshape(nb * lh, d, two_kwp)
    fd = jnp.broadcast_to(fd_ref[...][None], (nb * lh, 2 * ld, d))
    r2 = lax.dot_general(fd, b3, dn, preferred_element_type=f32)       # (nb*lh, 2*ld, 2*kwp)
    p2, q2 = r2[:, :ld, :], r2[:, ld:, :]
    c = jnp.concatenate([p2[..., :kwp] - q2[..., kwp:],
                         p2[..., kwp:] + q2[..., :kwp]], axis=-1)      # (nb*lh, ld, 2*kwp)

    # ---- store in (n, kd, kh, kw) order, lane-dense ------------------------------
    o_ref[...] = jnp.transpose(c.reshape(nb, lh, ld, two_kwp), (0, 2, 1, 3))


class RealFFT3Pallas:
    """JAX/Pallas port of modulus RealFFT3 (rfftn norm='ortho' + frequency truncation)."""

    def __init__(self, nd, nh, nw, ldmax=None, lhmax=None, lwmax=None):
        self.nd, self.nh, self.nw = nd, nh, nw
        self.ldmax = min(ldmax or nd, nd)
        self.lhmax = min(lhmax or nh, nh)
        self.lwmax = min(lwmax or nw // 2 + 1, nw // 2 + 1)
        self.ldmax_high = math.ceil(self.ldmax / 2)
        self.ldmax_low = math.floor(self.ldmax / 2)
        self.lhmax_high = math.ceil(self.lhmax / 2)
        self.lhmax_low = math.floor(self.lhmax / 2)

        # Frequencies kept by the PyTorch truncation, fused into the DFT matrices.
        # (Configs where the PyTorch cat itself would raise a shape error, e.g.
        #  lwmax < nw//2+1 together with lhmax < nh, are applied consistently here
        #  instead of erroring.)
        kd = _kept_rows(nd, self.ldmax_high, self.ldmax_low)
        kh = _kept_rows(nh, self.lhmax_high, self.lhmax_low)
        self.ld_out, self.lh_out = len(kd), len(kh)

        # lane-dense / sublane-dense padded extents used inside the kernel
        self.kwp = _round_up(max(self.lwmax, 1), 128)
        self.ld_pad = _round_up(self.ld_out, 8)
        self.lh_pad = _round_up(self.lh_out, 8)

        # stage-1 matrix: truncated W rDFT, zero-padded to kwp lanes, [Re | Im]
        fw = _dft_matrix(nw, self.lwmax)                               # (nw, lwmax)
        fwr = np.zeros((nw, self.kwp), np.float32)
        fwi = np.zeros((nw, self.kwp), np.float32)
        fwr[:, :self.lwmax] = fw.real
        fwi[:, :self.lwmax] = fw.imag
        self.fw_cat = jnp.asarray(np.concatenate([fwr, fwi], axis=1))  # (nw, 2*kwp)

        # stage-2 matrix: kept H frequencies, zero-padded rows, [Re ; Im]
        fh = _dft_matrix(nh)[kh, :]                                    # (lh_out, nh)
        fhr = np.zeros((self.lh_pad, nh), np.float32)
        fhi = np.zeros((self.lh_pad, nh), np.float32)
        fhr[:self.lh_out] = fh.real
        fhi[:self.lh_out] = fh.imag
        self.fh_stack = jnp.asarray(np.concatenate([fhr, fhi], axis=0))  # (2*lh_pad, nh)

        # stage-3 matrix: kept D frequencies, zero-padded rows, [Re ; Im]
        fd = _dft_matrix(nd)[kd, :]                                    # (ld_out, nd)
        fdr = np.zeros((self.ld_pad, nd), np.float32)
        fdi = np.zeros((self.ld_pad, nd), np.float32)
        fdr[:self.ld_out] = fd.real
        fdi[:self.ld_out] = fd.imag
        self.fd_stack = jnp.asarray(np.concatenate([fdr, fdi], axis=0))  # (2*ld_pad, nd)

    def __call__(self, x):
        *lead, d, h, w = x.shape
        assert (d, h, w) == (self.nd, self.nh, self.nw)
        n = int(np.prod(lead)) if lead else 1
        dh = d * h
        kwp, lh, ld = self.kwp, self.lh_pad, self.ld_pad

        # batch enough (b, c) volumes per grid step to give the MXU M >= 256 rows
        nb = max(1, -(-256 // dh))
        mult = 8 // math.gcd(dh, 8)
        nb = -(-nb // mult) * mult            # keep nb*dh sublane-aligned
        n_pad = -(-n // nb) * nb
        grid = n_pad // nb

        xf = jnp.reshape(x.astype(jnp.float32), (n, dh, w))
        if n_pad != n:
            xf = jnp.pad(xf, ((0, n_pad - n), (0, 0), (0, 0)))
        x2 = xf.reshape(n_pad * dh, w)

        kernel = partial(_rfft3_kernel, nb=nb, d=d, h=h, kwp=kwp, lh=lh, ld=ld)

        # explicit VMEM budget: double-buffered in/out blocks + constants + temps
        blk_in = nb * dh * w * 4
        blk_out = nb * ld * lh * 2 * kwp * 4
        consts = (w * 2 * kwp + 2 * lh * h + 2 * ld * d) * 4
        interm = 10 * nb * d * max(h, lh) * 2 * kwp * 4
        vmem = int(min(max(2 * (blk_in + blk_out) + 2 * consts + interm + (8 << 20),
                           32 << 20), 100 << 20))
        # TODO(synk): single-buffer the grid-invariant DFT-matrix inputs
        # (pipeline_mode=pl.Buffered(1)) once that is universally supported.

        out = pl.pallas_call(
            kernel,
            out_shape=jax.ShapeDtypeStruct((n_pad, ld, lh, 2 * kwp), jnp.float32),
            grid=(grid,),
            in_specs=[
                pl.BlockSpec((nb * dh, w), lambda i: (i, 0)),      # nb input volumes
                pl.BlockSpec((w, 2 * kwp), lambda i: (0, 0)),      # W rDFT matrix
                pl.BlockSpec((2 * lh, h), lambda i: (0, 0)),       # H DFT matrix
                pl.BlockSpec((2 * ld, d), lambda i: (0, 0)),       # D DFT matrix
            ],
            out_specs=pl.BlockSpec((nb, ld, lh, 2 * kwp), lambda i: (i, 0, 0, 0)),
            compiler_params=pltpu.CompilerParams(
                dimension_semantics=("parallel",),
                vmem_limit_bytes=vmem),
        )(x2, self.fw_cat, self.fh_stack, self.fd_stack)

        # strip batch / sublane / lane padding and assemble the complex result
        yr = out[:n, :self.ld_out, :self.lh_out, :self.lwmax]
        yi = out[:n, :self.ld_out, :self.lh_out, kwp:kwp + self.lwmax]
        y = lax.complex(yr, yi)                                   # complex64, like torch
        return y.reshape(*lead, self.ld_out, self.lh_out, self.lwmax)


if __name__ == "__main__":
    B, C = 2, 3
    nd, nh, nw = 8, 8, 16

    key = jax.random.PRNGKey(0)
    x = jax.random.normal(key, (B, C, nd, nh, nw), dtype=jnp.float32)

    ref_full = jnp.fft.rfftn(x, s=(nd, nh, nw), axes=(-3, -2, -1), norm="ortho")

    # --- config 1: defaults (no truncation) -----------------------------------
    m1 = RealFFT3Pallas(nd, nh, nw)
    y1 = jax.block_until_ready(m1(x))
    assert y1.shape == ref_full.shape, (y1.shape, ref_full.shape)
    assert y1.dtype == jnp.complex64, y1.dtype
    err1 = float(jnp.max(jnp.abs(y1 - ref_full)))

    # --- config 2: D-axis truncation (exercises the fused truncation path) -----
    m2 = RealFFT3Pallas(nd, nh, nw, ldmax=5)
    y2 = jax.block_until_ready(m2(x))
    ref2 = jnp.concatenate([ref_full[..., :m2.ldmax_high, :, :],
                            ref_full[..., -m2.ldmax_low:, :, :]], axis=-3)
    assert y2.shape == ref2.shape, (y2.shape, ref2.shape)
    err2 = float(jnp.max(jnp.abs(y2 - ref2)))

    # Default MXU precision = bf16 multiplies with f32 accumulation, so the
    # tolerance is looser than the old Precision.HIGHEST version (per review).
    assert err1 < 6e-2, f"config1 max abs error {err1}"
    assert err2 < 6e-2, f"config2 max abs error {err2}"
    print("KERNEL_OK")
</pallas_src>

<mosaic_0001>
module attributes {stable_mosaic.version = 11 : i64} {
  func.func @_rfft3_kernel(%arg0: i32, %arg1: memref<256x16xf32, #tpu.memory_space<vmem>>, %arg2: memref<16x256xf32, #tpu.memory_space<vmem>>, %arg3: memref<16x8xf32, #tpu.memory_space<vmem>>, %arg4: memref<16x8xf32, #tpu.memory_space<vmem>>, %arg5: memref<4x8x8x256xf32, #tpu.memory_space<vmem>>) attributes {dimension_semantics = [#tpu.dimension_semantics<parallel>], iteration_bounds = array<i64: 2>, scalar_prefetch = 0 : i64, scratch_operands = 0 : i64, tpu.core_type = #tpu.core_type<tc>, window_params = [{transform_indices = @transform_0, window_bounds = array<i64: 256, 16>}, {pipeline_mode = #tpu.pipeline_mode<synchronous>, transform_indices = @transform_1, window_bounds = array<i64: 16, 256>}, {pipeline_mode = #tpu.pipeline_mode<synchronous>, transform_indices = @transform_2, window_bounds = array<i64: 16, 8>}, {pipeline_mode = #tpu.pipeline_mode<synchronous>, transform_indices = @transform_3, window_bounds = array<i64: 16, 8>}, {transform_indices = @transform_4, window_bounds = array<i64: 4, 8, 8, 256>}]} {
    %c0 = arith.constant 0 : index
    %c0_0 = arith.constant 0 : index
    %0 = vector.load %arg1[%c0, %c0_0] : memref<256x16xf32, #tpu.memory_space<vmem>>, vector<256x16xf32>
    %c0_1 = arith.constant 0 : index
    %c0_2 = arith.constant 0 : index
    %1 = vector.load %arg2[%c0_1, %c0_2] : memref<16x256xf32, #tpu.memory_space<vmem>>, vector<16x256xf32>
    %cst = arith.constant dense<0.000000e+00> : vector<256x256xf32>
    %2 = tpu.matmul %0, %1, %cst {dimension_numbers = #tpu.dot_dimension_numbers<[1], [0], [0], [1], [0, 0, 1, 1], [], []>} : vector<256x16xf32>, vector<16x256xf32>, vector<256x256xf32> -> vector<256x256xf32>
    %3 = vector.shape_cast %2 : vector<256x256xf32> to vector<32x8x256xf32>
    %c0_3 = arith.constant 0 : index
    %c0_4 = arith.constant 0 : index
    %4 = vector.load %arg3[%c0_3, %c0_4] : memref<16x8xf32, #tpu.memory_space<vmem>>, vector<16x8xf32>
    %5 = vector.shape_cast %4 : vector<16x8xf32> to vector<1x16x8xf32>
    %6 = vector.shape_cast %5 : vector<1x16x8xf32> to vector<1x16x8xf32>
    %7 = vector.broadcast %6 : vector<1x16x8xf32> to vector<32x16x8xf32>
    %cst_5 = arith.constant dense<0.000000e+00> : vector<32x16x256xf32>
    %8 = tpu.matmul %7, %3, %cst_5 {dimension_numbers = #tpu.dot_dimension_numbers<[2], [1], [1], [2], [0, 0, 0, 1, 1, 2], [0], [0]>} : vector<32x16x8xf32>, vector<32x8x256xf32>, vector<32x16x256xf32> -> vector<32x16x256xf32>
    %9 = vector.extract_strided_slice %8 {offsets = [0, 0, 0], sizes = [32, 8, 256], strides = [1, 1, 1]} : vector<32x16x256xf32> to vector<32x8x256xf32>
    %10 = vector.extract_strided_slice %8 {offsets = [0, 8, 0], sizes = [32, 8, 256], strides = [1, 1, 1]} : vector<32x16x256xf32> to vector<32x8x256xf32>
    %11 = vector.extract_strided_slice %9 {offsets = [0, 0, 0], sizes = [32, 8, 128], strides = [1, 1, 1]} : vector<32x8x256xf32> to vector<32x8x128xf32>
    %12 = vector.extract_strided_slice %10 {offsets = [0, 0, 128], sizes = [32, 8, 128], strides = [1, 1, 1]} : vector<32x8x256xf32> to vector<32x8x128xf32>
    %13 = arith.subf %11, %12 : vector<32x8x128xf32>
    %14 = vector.extract_strided_slice %9 {offsets = [0, 0, 128], sizes = [32, 8, 128], strides = [1, 1, 1]} : vector<32x8x256xf32> to vector<32x8x128xf32>
    %15 = vector.extract_strided_slice %10 {offsets = [0, 0, 0], sizes = [32, 8, 128], strides = [1, 1, 1]} : vector<32x8x256xf32> to vector<32x8x128xf32>
    %16 = arith.addf %14, %15 : vector<32x8x128xf32>
    %17 = tpu.concatenate %13, %16 in 2 : vector<32x8x128xf32>, vector<32x8x128xf32> -> vector<32x8x256xf32>
    %18 = vector.shape_cast %17 : vector<32x8x256xf32> to vector<4x8x8x256xf32>
    %19 = tpu.transpose %18, [0, 2, 1, 3] : vector<4x8x8x256xf32> -> vector<4x8x8x256xf32>
    %20 = vector.shape_cast %19 : vector<4x8x8x256xf32> to vector<32x8x256xf32>
    %c0_6 = arith.constant 0 : index
    %c0_7 = arith.constant 0 : index
    %21 = vector.load %arg4[%c0_6, %c0_7] : memref<16x8xf32, #tpu.memory_space<vmem>>, vector<16x8xf32>
    %22 = vector.shape_cast %21 : vector<16x8xf32> to vector<1x16x8xf32>
    %23 = vector.shape_cast %22 : vector<1x16x8xf32> to vector<1x16x8xf32>
    %24 = vector.broadcast %23 : vector<1x16x8xf32> to vector<32x16x8xf32>
    %cst_8 = arith.constant dense<0.000000e+00> : vector<32x16x256xf32>
    %25 = tpu.matmul %24, %20, %cst_8 {dimension_numbers = #tpu.dot_dimension_numbers<[2], [1], [1], [2], [0, 0, 0, 1, 1, 2], [0], [0]>} : vector<32x16x8xf32>, vector<32x8x256xf32>, vector<32x16x256xf32> -> vector<32x16x256xf32>
    %26 = vector.extract_strided_slice %25 {offsets = [0, 0, 0], sizes = [32, 8, 256], strides = [1, 1, 1]} : vector<32x16x256xf32> to vector<32x8x256xf32>
    %27 = vector.extract_strided_slice %25 {offsets = [0, 8, 0], sizes = [32, 8, 256], strides = [1, 1, 1]} : vector<32x16x256xf32> to vector<32x8x256xf32>
    %28 = vector.extract_strided_slice %26 {offsets = [0, 0, 0], sizes = [32, 8, 128], strides = [1, 1, 1]} : vector<32x8x256xf32> to vector<32x8x128xf32>
    %29 = vector.extract_strided_slice %27 {offsets = [0, 0, 128], sizes = [32, 8, 128], strides = [1, 1, 1]} : vector<32x8x256xf32> to vector<32x8x128xf32>
    %30 = arith.subf %28, %29 : vector<32x8x128xf32>
    %31 = vector.extract_strided_slice %26 {offsets = [0, 0, 128], sizes = [32, 8, 128], strides = [1, 1, 1]} : vector<32x8x256xf32> to vector<32x8x128xf32>
    %32 = vector.extract_strided_slice %27 {offsets = [0, 0, 0], sizes = [32, 8, 128], strides = [1, 1, 1]} : vector<32x8x256xf32> to vector<32x8x128xf32>
    %33 = arith.addf %31, %32 : vector<32x8x128xf32>
    %34 = tpu.concatenate %30, %33 in 2 : vector<32x8x128xf32>, vector<32x8x128xf32> -> vector<32x8x256xf32>
    %35 = vector.shape_cast %34 : vector<32x8x256xf32> to vector<4x8x8x256xf32>
    %36 = tpu.transpose %35, [0, 2, 1, 3] : vector<4x8x8x256xf32> -> vector<4x8x8x256xf32>
    %c0_9 = arith.constant 0 : index
    %c0_10 = arith.constant 0 : index
    %c0_11 = arith.constant 0 : index
    %c0_12 = arith.constant 0 : index
    %37 = vector.load %arg5[%c0_9, %c0_10, %c0_11, %c0_12] : memref<4x8x8x256xf32, #tpu.memory_space<vmem>>, vector<4x8x8x256xf32>
    tpu.vector_store %arg5[%c0_9, %c0_10, %c0_11, %c0_12], %36 {strides = array<i32>} : memref<4x8x8x256xf32, #tpu.memory_space<vmem>>, vector<4x8x8x256xf32>,
    return
  }
  func.func @transform_0(%arg0: i32) -> (i32, i32) {
    %c0_i32 = arith.constant 0 : i32
    %c0_i32_0 = arith.constant 0 : i32
    return %arg0, %c0_i32 : i32, i32
  }
  func.func @transform_1(%arg0: i32) -> (i32, i32) {
    %c0_i32 = arith.constant 0 : i32
    %c0_i32_0 = arith.constant 0 : i32
    %c0_i32_1 = arith.constant 0 : i32
    return %c0_i32, %c0_i32_0 : i32, i32
  }
  func.func @transform_2(%arg0: i32) -> (i32, i32) {
    %c0_i32 = arith.constant 0 : i32
    %c0_i32_0 = arith.constant 0 : i32
    %c0_i32_1 = arith.constant 0 : i32
    return %c0_i32, %c0_i32_0 : i32, i32
  }
  func.func @transform_3(%arg0: i32) -> (i32, i32) {
    %c0_i32 = arith.constant 0 : i32
    %c0_i32_0 = arith.constant 0 : i32
    %c0_i32_1 = arith.constant 0 : i32
    return %c0_i32, %c0_i32_0 : i32, i32
  }
  func.func @transform_4(%arg0: i32) -> (i32, i32, i32, i32) {
    %c0_i32 = arith.constant 0 : i32
    %c0_i32_0 = arith.constant 0 : i32
    %c0_i32_1 = arith.constant 0 : i32
    %c0_i32_2 = arith.constant 0 : i32
    return %arg0, %c0_i32, %c0_i32_0, %c0_i32_1 : i32, i32, i32, i32
  }
}

</mosaic_0001>

<bundles_post_ra>
// kernel: tpu_custom_call.1
= control target key start
LH: loop header
LB: loop body
LE: loop exit
PB: predicated region body
PF: predicated region fallthrough
CT: control target
= control target key end

     0   :  { %9 = vsyncpa [#allocation3], 0  ;;  %s9778_s0 = inlined_call_operand.vmem [shape: f32[512,16], index: 0, kind: input, shape index: {}]   ;;  %s9779_s1 = inlined_call_operand.vmem [shape: f32[16,256], index: 1, kind: input, shape index: {}]   ;;  %s9780_s2 = inlined_call_operand.vmem [shape: f32[16,8], index: 2, kind: input, shape index: {}]   ;;  %s9781_s3 = inlined_call_operand.vmem [shape: f32[16,8], index: 3, kind: input, shape index: {}]   ;;  %s9782_s4 = inlined_call_operand.hbm [shape: f32[8,8,8,256], index: 4, kind: output, shape index: {}]  }
   0x1   :  { %11 = vsyncpa [#allocation3 + $0x1], 0  ;;  %s8299_s15 = smov 0   ;;  %s8301_s16 = smov 0  }
   0x2   :  { %s8303_s17 = smov 0   ;;  %s8305_s18 = smov 0  }
   0x3 LB: > { %s8320_s19 = sadd.s32 4294967295, %s8266_s18   ;;  %s7979_s20 = sadd.s32 4294967294, %s8266_s18   ;;  %s8266_s18 = sphi %s8305_s18, %s9792_s18   ;;  %s8262_s17 = sphi %s8303_s17, %s9791_s17   ;;  %s8258_s16 = sphi %s8301_s16, %s9790_s16   ;;  %s8254_s15 = sphi %s8299_s15, %s9789_s15  }
   0x4   : > { %s8324_s21 = sadd.s32 1, %s8266_s18   ;;  %s113_s22 = sadd.s32 1, %s8262_s17 }
   0x5   : > { %s110_s23 = ssub.s32 %s8266_s18, %s8324_s21  ;;  %p123_p0 = scmp.ne.s32.totalorder %s8262_s17, %s8258_s16 }
   0x6   : > { %p111_p1 = scmp.eq.s32.totalorder %s110_s23, 0  ;;  %p124_p2 = scmp.eq.s32.totalorder %s8320_s19, 1 }
   0x7   : > { %p129_p3 = scmp.ne.s32.totalorder %s8258_s16, %s8254_s15  ;;  %p130_p4 = scmp.eq.s32.totalorder %s7979_s20, 1 }
   0x8   : > { %s8335_s24 = scalar_select %p111_p1, %s8262_s17, %s113_s22  }
   0x9   : > { %p8337_p5 = por %p124_p2, %p123_p0  ;;  %p8341_p6 = por %p130_p4, %p129_p3 }
   0xa   : > { %p7982_p7 = scmp.ge.s32.totalorder %s8266_s18, 1  ;;  %p166_p8 = scmp.lt.s32.totalorder %s8266_s18, 3 }
   0xc   : > { %p167_p9 = pnand %p7982_p7, %p166_p8 }
   0xd   : > { %v232_v0 = vld [vmem:[%s9779_s1 + $0x8] sm:$0xff] (!%p167_p9)  ;;  %v234_v1 = vld [vmem:[%s9779_s1 + $0x18] sm:$0xff] (!%p167_p9)  ;;  %v231_v2 = vld [vmem:[%s9779_s1] sm:$0xff] (!%p167_p9)  ;;  %s7984_s7 = sshll.u32 (!%p167_p9), %s8320_s19, 5  ;;  %v8268_v5 = vmov (!%p167_p9), 0.0   ;;  %vm235_vm0 = vcmask (!%p167_p9), 130048  }
   0xe   : > { %170 = sbr.rel (%p167_p9) target bundleno = 930 (0x3a2), region = 36  ;;  %v8154_v3 = vpack.c.bf16 (!%p167_p9), %v234_v1, %v232_v0  ;;  %v233_v4 = vld [vmem:[%s9779_s1 + $0x10] sm:$0xff] (!%p167_p9)  ;;  %396 = vmatprep.mubr.f32.mxu0 (!%p167_p9), %v8268_v5  ;;  %p193_p10 = scmp.lt.s32.totalorder (!%p167_p9), %s7984_s7, 63  ;;  %662 = vmatprep.mubr.f32.mxu1 (!%p167_p9), %v8268_v5  ;;  %v8466_v41 = vld [vmem:[%s9780_s2] sm:$0xff] (!%p167_p9)  ;;  %vm591_vm1 = vcmask (!%p167_p9), 64512   ;;  %v8474_v44 = vld [vmem:[%s9780_s2 + $0x8] sm:$0xff] (!%p167_p9) }
   0xf   : > { %v8156_v6 = vpack.c.bf16 (!%p167_p9), %v233_v4, %v231_v2  ;;  %s189_s9 = sand.u32 (!%p167_p9), 1, %s8258_s16   ;;  %s8153_s12 = sshll.u32 (!%p167_p9), %s8320_s19, 13 }
  0x10   : > { %8155 = vmatprep.subr.bf16.mxu0 (!%p167_p9), %v8154_v3  ;;  %s9719_s20 = scalar_lea.hbm (!%p167_p9), %s9782_s4, %s8153_s12  ;;  %s9737_s22 = scalar_lea.sflag (!%p167_p9), [#allocation3], %s189_s9 }
  0x11   : > { %8157 = vmatpush1.bf16.msra.mxu0 (!%p167_p9), %v8156_v6  ;;  %s8271_s27 = smov (!%p167_p9), [#allocation2]  }
  0x12   : > { %s8208_s28 = sshll.u32 (!%p167_p9), %s8271_s27, 4  ;;  %s8209_s28 = int_to_ptr.vmem [resolvable:$false] %s8208_s28 }
  0x13   : > { %s8210_s29 = scalar_lea.vmem (!%p167_p9), %s8209_s28, 16384 }
  0x15   : > { %s9794_s7 = smov (!%p193_p10, %s7984_s7), 63 }
  0x16   : > { %s7985_s10 = sshll.u32 %s9794_s7, 3 }
  0x17   : > { %s8365_s13 = scalar_lea.vmem %s9778_s0, %s7985_s10  ;;  %s7983_s10 = sshll.u32 %s189_s9, 9 }
  0x18   : > { %v199_v7 = vld [vmem:[%s8365_s13] sm:$0xff]  ;;  %v200_v8 = vld [vmem:[%s8365_s13 + $0x8] sm:$0xff]  ;;  %v201_v9 = vld [vmem:[%s8365_s13 + $0x10] sm:$0xff]  ;;  %s9476_s11 = scalar_lea.vmem [#allocation2], %s7983_s10 }
  0x19   : > { %7986 = vmatmul.mubr.msk.f32.vlgmr.msra.gmra.mrb[0].mxu0 %vm235_vm0, %v199_v7  ;;  %v202_v10 = vld [vmem:[%s8365_s13 + $0x18] sm:$0xff]  ;;  %v203_v11 = vld [vmem:[%s8365_s13 + $0x20] sm:$0xff]  ;;  %v204_v12 = vld [vmem:[%s8365_s13 + $0x28] sm:$0xff] }
  0x1a   : > { %402 = vmatprep.mubr.f32.mxu0 %v8268_v5  ;;  %v205_v13 = vld [vmem:[%s8365_s13 + $0x30] sm:$0xff]  ;;  %v206_v14 = vld [vmem:[%s8365_s13 + $0x38] sm:$0xff]  ;;  %v207_v15 = vld [vmem:[%s8365_s13 + $0x40] sm:$0xff] }
  0x1b   : > { %v208_v16 = vld [vmem:[%s8365_s13 + $0x48] sm:$0xff]  ;;  %v209_v17 = vld [vmem:[%s8365_s13 + $0x50] sm:$0xff]  ;;  %v210_v18 = vld [vmem:[%s8365_s13 + $0x58] sm:$0xff] }
  0x1c   : > { %v211_v19 = vld [vmem:[%s8365_s13 + $0x60] sm:$0xff]  ;;  %v212_v20 = vld [vmem:[%s8365_s13 + $0x68] sm:$0xff]  ;;  %v213_v21 = vld [vmem:[%s8365_s13 + $0x70] sm:$0xff] }
  0x1d   : > { %7987 = vmatmul.mubr.msk.f32.gmra.mrb[2].mxu0 %vm235_vm0, %v200_v8  ;;  %v214_v22 = vld [vmem:[%s8365_s13 + $0x78] sm:$0xff]  ;;  %v215_v23 = vld [vmem:[%s8365_s13 + $0x80] sm:$0xff]  ;;  %v216_v24 = vld [vmem:[%s8365_s13 + $0x88] sm:$0xff] }
  0x1e   : > { %408 = vmatprep.mubr.f32.mxu0 %v8268_v5  ;;  %v217_v25 = vld [vmem:[%s8365_s13 + $0x90] sm:$0xff]  ;;  %v218_v26 = vld [vmem:[%s8365_s13 + $0x98] sm:$0xff]  ;;  %v219_v27 = vld [vmem:[%s8365_s13 + $0xa0] sm:$0xff] }
  0x1f   : > { %v220_v28 = vld [vmem:[%s8365_s13 + $0xa8] sm:$0xff]  ;;  %v221_v29 = vld [vmem:[%s8365_s13 + $0xb0] sm:$0xff]  ;;  %v222_v30 = vld [vmem:[%s8365_s13 + $0xb8] sm:$0xff] }
  0x20   : > { %v223_v31 = vld [vmem:[%s8365_s13 + $0xc0] sm:$0xff]  ;;  %v224_v32 = vld [vmem:[%s8365_s13 + $0xc8] sm:$0xff]  ;;  %v225_v33 = vld [vmem:[%s8365_s13 + $0xd0] sm:$0xff] }
  0x21   : > { %7988 = vmatmul.mubr.msk.f32.gmra.mrb[4].mxu0 %vm235_vm0, %v201_v9  ;;  %v226_v34 = vld [vmem:[%s8365_s13 + $0xd8] sm:$0xff]  ;;  %v227_v35 = vld [vmem:[%s8365_s13 + $0xe0] sm:$0xff]  ;;  %v228_v36 = vld [vmem:[%s8365_s13 + $0xe8] sm:$0xff] }
  0x22   : > { %414 = vmatprep.mubr.f32.mxu0 %v8268_v5  ;;  %v229_v37 = vld [vmem:[%s8365_s13 + $0xf0] sm:$0xff]  ;;  %v230_v38 = vld [vmem:[%s8365_s13 + $0xf8] sm:$0xff]  ;;  %s7917_s13 = sshll.u32 %s9476_s11, 4  ;;  %s9721_s13 = int_to_ptr.vmem [resolvable:$true] %s7917_s13 }
  0x23   : > { %s8204_s23 = scalar_lea.vmem %s9721_s13, 8192  ;;  %p8211_p0 = scmp.lt.s32.totalorder %s9721_s13, %s8209_s28 }
  0x24   : > { %p8205_p11 = scmp.ne.s32.totalorder %s9721_s13, %s8204_s23  ;;  %p8212_p1 = scmp.lt.s32.totalorder %s8210_s29, %s8204_s23 }
  0x25   : > { %7989 = vmatmul.mubr.msk.f32.gmra.mrb[6].mxu0 %vm235_vm0, %v202_v10 }
  0x26   : > { %420 = vmatprep.mubr.f32.mxu0 %v8268_v5  ;;  %p8206_p12 = pnand %p8205_p11, %p8337_p5  ;;  %p8213_p2 = por %p8212_p1, %p8211_p0 }
  0x28   : > { %p8207_p13 = pneg %p8206_p12 }
  0x29   : > { %7990 = vmatmul.mubr.msk.f32.gmra.mrb[8].mxu0 %vm235_vm0, %v203_v11 }
  0x2a   : > { %426 = vmatprep.mubr.f32.mxu0 %v8268_v5  ;;  %p8214_p3 = pnand %p8213_p2, %p8207_p13 }
  0x2d   : > { %7991 = vmatmul.mubr.msk.f32.gmra.mrb[10].mxu0 %vm235_vm0, %v204_v12 }
  0x2e   : > { %432 = vmatprep.mubr.f32.mxu0 %v8268_v5 }
  0x31   : > { %7992 = vmatmul.mubr.msk.f32.gmra.mrb[12].mxu0 %vm235_vm0, %v205_v13 }
  0x32   : > { %438 = vmatprep.mubr.f32.mxu0 %v8268_v5 }
  0x35   : > { %7993 = vmatmul.mubr.msk.f32.gmra.mrb[14].mxu0 %vm235_vm0, %v206_v14 }
  0x36   : > { %444 = vmatprep.mubr.f32.mxu0 %v8268_v5 }
  0x39   : > { %7994 = vmatmul.mubr.msk.f32.gmra.mrb[16].mxu0 %vm235_vm0, %v207_v15 }
  0x3a   : > { %450 = vmatprep.mubr.f32.mxu0 %v8268_v5 }
  0x3d   : > { %7995 = vmatmul.mubr.msk.f32.gmra.mrb[18].mxu0 %vm235_vm0, %v208_v16 }
  0x3e   : > { %456 = vmatprep.mubr.f32.mxu0 %v8268_v5 }
  0x41   : > { %7996 = vmatmul.mubr.msk.f32.gmra.mrb[20].mxu0 %vm235_vm0, %v209_v17 }
  0x42   : > { %462 = vmatprep.mubr.f32.mxu0 %v8268_v5 }
  0x45   : > { %7997 = vmatmul.mubr.msk.f32.gmra.mrb[22].mxu0 %vm235_vm0, %v210_v18 }
  0x46   : > { %468 = vmatprep.mubr.f32.mxu0 %v8268_v5 }
  0x49   : > { %7998 = vmatmul.mubr.msk.f32.gmra.mrb[24].mxu0 %vm235_vm0, %v211_v19 }
  0x4a   : > { %474 = vmatprep.mubr.f32.mxu0 %v8268_v5 }
  0x4d   : > { %7999 = vmatmul.mubr.msk.f32.gmra.mrb[26].mxu0 %vm235_vm0, %v212_v20 }
  0x4e   : > { %480 = vmatprep.mubr.f32.mxu0 %v8268_v5 }
  0x51   : > { %8000 = vmatmul.mubr.msk.f32.gmra.mrb[28].mxu0 %vm235_vm0, %v213_v21 }
  0x52   : > { %486 = vmatprep.mubr.f32.mxu0 %v8268_v5 }
  0x55   : > { %8001 = vmatmul.mubr.msk.f32.gmra.mrb[30].mxu0 %vm235_vm0, %v214_v22 }
  0x56   : > { %492 = vmatprep.mubr.f32.mxu0 %v8268_v5 }
  0x59   : > { %8002 = vmatmul.mubr.msk.f32.gmra.mrb[32].mxu0 %vm235_vm0, %v215_v23 }
  0x5a   : > { %498 = vmatprep.mubr.f32.mxu0 %v8268_v5 }
  0x5d   : > { %8003 = vmatmul.mubr.msk.f32.gmra.mrb[34].mxu0 %vm235_vm0, %v216_v24 }
  0x5e   : > { %504 = vmatprep.mubr.f32.mxu0 %v8268_v5 }
  0x61   : > { %8004 = vmatmul.mubr.msk.f32.gmra.mrb[36].mxu0 %vm235_vm0, %v217_v25 }
  0x62   : > { %510 = vmatprep.mubr.f32.mxu0 %v8268_v5 }
  0x65   : > { %8005 = vmatmul.mubr.msk.f32.gmra.mrb[38].mxu0 %vm235_vm0, %v218_v26 }
  0x66   : > { %516 = vmatprep.mubr.f32.mxu0 %v8268_v5 }
  0x69   : > { %8006 = vmatmul.mubr.msk.f32.gmra.mrb[40].mxu0 %vm235_vm0, %v219_v27 }
  0x6a   : > { %522 = vmatprep.mubr.f32.mxu0 %v8268_v5 }
  0x6d   : > { %8007 = vmatmul.mubr.msk.f32.gmra.mrb[42].mxu0 %vm235_vm0, %v220_v28 }
  0x6e   : > { %528 = vmatprep.mubr.f32.mxu0 %v8268_v5 }
  0x71   : > { %8008 = vmatmul.mubr.msk.f32.gmra.mrb[44].mxu0 %vm235_vm0, %v221_v29 }
  0x72   : > { %534 = vmatprep.mubr.f32.mxu0 %v8268_v5 }
  0x75   : > { %8009 = vmatmul.mubr.msk.f32.gmra.mrb[46].mxu0 %vm235_vm0, %v222_v30 }
  0x76   : > { %540 = vmatprep.mubr.f32.mxu0 %v8268_v5 }
  0x79   : > { %8010 = vmatmul.mubr.msk.f32.gmra.mrb[48].mxu0 %vm235_vm0, %v223_v31 }
  0x7a   : > { %546 = vmatprep.mubr.f32.mxu0 %v8268_v5 }
  0x7d   : > { %8011 = vmatmul.mubr.msk.f32.gmra.mrb[50].mxu0 %vm235_vm0, %v224_v32 }
  0x7e   : > { %552 = vmatprep.mubr.f32.mxu0 %v8268_v5 }
  0x81   : > { %8012 = vmatmul.mubr.msk.f32.gmra.mrb[52].mxu0 %vm235_vm0, %v225_v33 }
  0x82   : > { %558 = vmatprep.mubr.f32.mxu0 %v8268_v5 }
  0x85   : > { %8013 = vmatmul.mubr.msk.f32.gmra.mrb[54].mxu0 %vm235_vm0, %v226_v34 }
  0x86   : > { %564 = vmatprep.mubr.f32.mxu0 %v8268_v5 }
  0x89   : > { %8014 = vmatmul.mubr.msk.f32.gmra.mrb[56].mxu0 %vm235_vm0, %v227_v35 }
  0x8a   : > { %570 = vmatprep.mubr.f32.mxu0 %v8268_v5 }
  0x8d   : > { %8015 = vmatmul.mubr.msk.f32.gmra.mrb[58].mxu0 %vm235_vm0, %v228_v36 }
  0x8e   : > { %576 = vmatprep.mubr.f32.mxu0 %v8268_v5 }
  0x91   : > { %8016 = vmatmul.mubr.msk.f32.gmra.mrb[60].mxu0 %vm235_vm0, %v229_v37 }
  0x92   : > { %582 = vmatprep.mubr.f32.mxu0 %v8268_v5 }
  0x95   : > { %8017 = vmatmul.mubr.msk.f32.gmra.mrb[62].mxu0 %vm235_vm0, %v230_v38 }
  0x96   : > { %1971 = vmatprep.mubr.f32.mxu0 %v8268_v5 }
  0xec   : > { %v398_v39 = vpop.f32.mrb[0].mxu0 }
  0xed   : > { %v400_v40 = vpop.f32.mrb[1].mxu0 }
  0xee   : > { %598 = vmatprep.subr.mxu1 %v400_v40 }
  0xef   : > { %599 = vmatpush1.msra.mxu1 %v398_v39 }
  0xf0   : > { %v404_v42 = vpop.f32.mrb[2].mxu0  ;;  %8018 = vmatmul.mubr.msk.f32.vlgmr.msra.gmra.mrb[0].mxu1 %vm591_vm1, %v8466_v41 }
  0xf1   : > { %v406_v43 = vpop.f32.mrb[3].mxu0  ;;  %668 = vmatprep.mubr.f32.mxu1 %v8268_v5 }
  0xf2   : > { %675 = vmatprep.subr.mxu1 %v406_v43 }
  0xf3   : > { %676 = vmatpush1.msra.mxu1 %v404_v42 }
  0xf4   : > { %v410_v45 = vpop.f32.mrb[4].mxu0  ;;  %8019 = vmatmul.mubr.msk.f32.gmra.mrb[2].mxu1 %vm591_vm1, %v8474_v44 }
  0xf5   : > { %v412_v46 = vpop.f32.mrb[5].mxu0  ;;  %739 = vmatprep.mubr.f32.mxu1 %v8268_v5 }
  0xf6   : > { %752 = vmatprep.subr.mxu1 %v412_v46 }
  0xf8   : > { %v416_v47 = vpop.f32.mrb[6].mxu0  ;;  %8020 = vmatmul.mubr.msk.f32.vlgmr.msra.gmra.mrb[4].mxu1 %vm591_vm1, %v8466_v41 }
  0xf9   : > { %753 = vmatpush1.msra.mxu1 %v410_v45  ;;  %v418_v48 = vpop.f32.mrb[7].mxu0  ;;  %745 = vmatprep.mubr.f32.mxu1 %v8268_v5 }
  0xfa   : > { %829 = vmatprep.subr.mxu1 %v418_v48 }
  0xfc   : > { %v422_v49 = vpop.f32.mrb[8].mxu0  ;;  %8021 = vmatmul.mubr.msk.f32.gmra.mrb[6].mxu1 %vm591_vm1, %v8474_v44 }
  0xfd   : > { %v424_v50 = vpop.f32.mrb[9].mxu0  ;;  %816 = vmatprep.mubr.f32.mxu1 %v8268_v5 }
 0x100   : > { %v428_v51 = vpop.f32.mrb[10].mxu0  ;;  %8022 = vmatmul.mubr.msk.f32.vlgmr.msra.gmra.mrb[8].mxu1 %vm591_vm1, %v8466_v41 }
 0x101   : > { %830 = vmatpush1.msra.mxu1 %v416_v47  ;;  %v430_v52 = vpop.f32.mrb[11].mxu0  ;;  %822 = vmatprep.mubr.f32.mxu1 %v8268_v5 }
 0x102   : > { %906 = vmatprep.subr.mxu1 %v424_v50 }
 0x104   : > { %v434_v53 = vpop.f32.mrb[12].mxu0  ;;  %8023 = vmatmul.mubr.msk.f32.gmra.mrb[10].mxu1 %vm591_vm1, %v8474_v44 }
 0x105   : > { %v436_v54 = vpop.f32.mrb[13].mxu0  ;;  %893 = vmatprep.mubr.f32.mxu1 %v8268_v5 }
 0x108   : > { %v440_v55 = vpop.f32.mrb[14].mxu0  ;;  %8024 = vmatmul.mubr.msk.f32.vlgmr.msra.gmra.mrb[12].mxu1 %vm591_vm1, %v8466_v41 }
 0x109   : > { %907 = vmatpush1.msra.mxu1 %v422_v49  ;;  %v442_v56 = vpop.f32.mrb[15].mxu0  ;;  %899 = vmatprep.mubr.f32.mxu1 %v8268_v5 }
 0x10a   : > { %983 = vmatprep.subr.mxu1 %v430_v52 }
 0x10c   : > { %v446_v57 = vpop.f32.mrb[16].mxu0  ;;  %8025 = vmatmul.mubr.msk.f32.gmra.mrb[14].mxu1 %vm591_vm1, %v8474_v44 }
 0x10d   : > { %v448_v58 = vpop.f32.mrb[17].mxu0  ;;  %970 = vmatprep.mubr.f32.mxu1 %v8268_v5 }
 0x110   : > { %v452_v59 = vpop.f32.mrb[18].mxu0  ;;  %8026 = vmatmul.mubr.msk.f32.vlgmr.msra.gmra.mrb[16].mxu1 %vm591_vm1, %v8466_v41 }
 0x111   : > { %984 = vmatpush1.msra.mxu1 %v428_v51  ;;  %v454_v60 = vpop.f32.mrb[19].mxu0  ;;  %976 = vmatprep.mubr.f32.mxu1 %v8268_v5 }
 0x112   : > { %1060 = vmatprep.subr.mxu1 %v436_v54 }
 0x114   : > { %v458_v61 = vpop.f32.mrb[20].mxu0  ;;  %8027 = vmatmul.mubr.msk.f32.gmra.mrb[18].mxu1 %vm591_vm1, %v8474_v44 }
 0x115   : > { %v460_v62 = vpop.f32.mrb[21].mxu0  ;;  %1047 = vmatprep.mubr.f32.mxu1 %v8268_v5 }
 0x118   : > { %v8503_v63 = vpop.f32.mrb[22].mxu0  ;;  %8028 = vmatmul.mubr.msk.f32.vlgmr.msra.gmra.mrb[20].mxu1 %vm591_vm1, %v8466_v41 }
 0x119   : > { %1061 = vmatpush1.msra.mxu1 %v434_v53  ;;  %v466_v0 = vpop.f32.mrb[23].mxu0  ;;  %1053 = vmatprep.mubr.f32.mxu1 %v8268_v5 }
 0x11a   : > { %1137 = vmatprep.subr.mxu1 %v442_v56 }
 0x11c   : > { %v8508_v1 = vpop.f32.mrb[24].mxu0  ;;  %8029 = vmatmul.mubr.msk.f32.gmra.mrb[22].mxu1 %vm591_vm1, %v8474_v44 }
 0x11d   : > { %v472_v2 = vpop.f32.mrb[25].mxu0  ;;  %1124 = vmatprep.mubr.f32.mxu1 %v8268_v5 }
 0x120   : > { %v8513_v3 = vpop.f32.mrb[26].mxu0  ;;  %8030 = vmatmul.mubr.msk.f32.vlgmr.msra.gmra.mrb[24].mxu1 %vm591_vm1, %v8466_v41 }
 0x121   : > { %1138 = vmatpush1.msra.mxu1 %v440_v55  ;;  %v8517_v4 = vpop.f32.mrb[27].mxu0  ;;  %1130 = vmatprep.mubr.f32.mxu1 %v8268_v5 }
 0x122   : > { %1214 = vmatprep.subr.mxu1 %v448_v58 }
 0x124   : > { %v8520_v6 = vpop.f32.mrb[28].mxu0  ;;  %8031 = vmatmul.mubr.msk.f32.gmra.mrb[26].mxu1 %vm591_vm1, %v8474_v44 }
 0x125   : > { %v8524_v7 = vpop.f32.mrb[29].mxu0  ;;  %1201 = vmatprep.mubr.f32.mxu1 %v8268_v5 }
 0x128   : > { %v8527_v8 = vpop.f32.mrb[30].mxu0  ;;  %8032 = vmatmul.mubr.msk.f32.vlgmr.msra.gmra.mrb[28].mxu1 %vm591_vm1, %v8466_v41 }
 0x129   : > { %1215 = vmatpush1.msra.mxu1 %v446_v57  ;;  %v8531_v9 = vpop.f32.mrb[31].mxu0  ;;  %1207 = vmatprep.mubr.f32.mxu1 %v8268_v5 }
 0x12a   : > { %1291 = vmatprep.subr.mxu1 %v454_v60  ;;  %v3131_v60 = vlaneseq }
 0x12c   : > { %v8534_v10 = vpop.f32.mrb[32].mxu0  ;;  %8033 = vmatmul.mubr.msk.f32.gmra.mrb[30].mxu1 %vm591_vm1, %v8474_v44 }
 0x12d   : > { %v8538_v11 = vpop.f32.mrb[33].mxu0  ;;  %1278 = vmatprep.mubr.f32.mxu1 %v8268_v5 }
 0x130   : > { %v500_v12 = vpop.f32.mrb[34].mxu0  ;;  %8034 = vmatmul.mubr.msk.f32.vlgmr.msra.gmra.mrb[32].mxu1 %vm591_vm1, %v8466_v41 }
 0x131   : > { %1292 = vmatpush1.msra.mxu1 %v452_v59  ;;  %v502_v13 = vpop.f32.mrb[35].mxu0  ;;  %1284 = vmatprep.mubr.f32.mxu1 %v8268_v5  ;;  %v8269_v59 = vmov 1983009808  }
 0x132   : > { %1368 = vmatprep.subr.mxu1 %v460_v62  ;;  %1907 = vmatprep.subr.mxu0 %v502_v13 }
 0x133   : > { %1908 = vmatpush1.msra.mxu0 %v500_v12 }
 0x134   : > { %8035 = vmatmul.mubr.msk.f32.gmra.mrb[34].mxu1 %vm591_vm1, %v8474_v44  ;;  %8052 = vmatmul.mubr.msk.f32.vlgmr.msra.gmra.mrb[64].mxu0 %vm591_vm1, %v8466_v41  ;;  %v8548_v14 = vpop.f32.mrb[36].mxu0 }
 0x135   : > { %1355 = vmatprep.mubr.f32.mxu1 %v8268_v5  ;;  %v8551_v15 = vpop.f32.mrb[37].mxu0  ;;  %1977 = vmatprep.mubr.f32.mxu0 %v8268_v5 }
 0x138   : > { %8036 = vmatmul.mubr.msk.f32.vlgmr.msra.gmra.mrb[36].mxu1 %vm591_vm1, %v8466_v41  ;;  %v512_v16 = vpop.f32.mrb[38].mxu0  ;;  %8053 = vmatmul.mubr.msk.f32.gmra.mrb[66].mxu0 %vm591_vm1, %v8474_v44 }
 0x139   : > { %1369 = vmatpush1.msra.mxu1 %v458_v61  ;;  %1361 = vmatprep.mubr.f32.mxu1 %v8268_v5  ;;  %v514_v17 = vpop.f32.mrb[39].mxu0 }
 0x13a   : > { %1445 = vmatprep.subr.mxu1 %v466_v0  ;;  %2061 = vmatprep.subr.mxu0 %v514_v17 }
 0x13b   : > { %2062 = vmatpush1.msra.mxu0 %v512_v16  ;;  %2125 = vmatprep.mubr.f32.mxu0 %v8268_v5 }
 0x13c   : > { %8037 = vmatmul.mubr.msk.f32.gmra.mrb[38].mxu1 %vm591_vm1, %v8474_v44  ;;  %8056 = vmatmul.mubr.msk.f32.vlgmr.msra.gmra.mrb[68].mxu0 %vm591_vm1, %v8466_v41  ;;  %v8564_v18 = vpop.f32.mrb[40].mxu0 }
 0x13d   : > { %1432 = vmatprep.mubr.f32.mxu1 %v8268_v5  ;;  %v8567_v19 = vpop.f32.mrb[41].mxu0  ;;  %2131 = vmatprep.mubr.f32.mxu0 %v8268_v5 }
 0x140   : > { %8038 = vmatmul.mubr.msk.f32.vlgmr.msra.gmra.mrb[40].mxu1 %vm591_vm1, %v8466_v41  ;;  %v524_v20 = vpop.f32.mrb[42].mxu0  ;;  %8057 = vmatmul.mubr.msk.f32.gmra.mrb[70].mxu0 %vm591_vm1, %v8474_v44 }
 0x141   : > { %1446 = vmatpush1.msra.mxu1 %v8503_v63  ;;  %1438 = vmatprep.mubr.f32.mxu1 %v8268_v5  ;;  %v526_v21 = vpop.f32.mrb[43].mxu0 }
 0x142   : > { %1522 = vmatprep.subr.mxu1 %v472_v2  ;;  %2215 = vmatprep.subr.mxu0 %v526_v21 }
 0x143   : > { %2216 = vmatpush1.msra.mxu0 %v524_v20  ;;  %2279 = vmatprep.mubr.f32.mxu0 %v8268_v5 }
 0x144   : > { %8039 = vmatmul.mubr.msk.f32.gmra.mrb[42].mxu1 %vm591_vm1, %v8474_v44  ;;  %8060 = vmatmul.mubr.msk.f32.vlgmr.msra.gmra.mrb[72].mxu0 %vm591_vm1, %v8466_v41  ;;  %v8581_v22 = vpop.f32.mrb[44].mxu0 }
 0x145   : > { %1509 = vmatprep.mubr.f32.mxu1 %v8268_v5  ;;  %v8584_v23 = vpop.f32.mrb[45].mxu0  ;;  %2285 = vmatprep.mubr.f32.mxu0 %v8268_v5 }
 0x148   : > { %8040 = vmatmul.mubr.msk.f32.vlgmr.msra.gmra.mrb[44].mxu1 %vm591_vm1, %v8466_v41  ;;  %v536_v24 = vpop.f32.mrb[46].mxu0  ;;  %8061 = vmatmul.mubr.msk.f32.gmra.mrb[74].mxu0 %vm591_vm1, %v8474_v44 }
 0x149   : > { %1523 = vmatpush1.msra.mxu1 %v8508_v1  ;;  %1515 = vmatprep.mubr.f32.mxu1 %v8268_v5  ;;  %v538_v25 = vpop.f32.mrb[47].mxu0 }
 0x14a   : > { %1599 = vmatprep.subr.mxu1 %v8517_v4  ;;  %2369 = vmatprep.subr.mxu0 %v538_v25 }
 0x14b   : > { %2370 = vmatpush1.msra.mxu0 %v536_v24  ;;  %2433 = vmatprep.mubr.f32.mxu0 %v8268_v5 }
 0x14c   : > { %8041 = vmatmul.mubr.msk.f32.gmra.mrb[46].mxu1 %vm591_vm1, %v8474_v44  ;;  %8064 = vmatmul.mubr.msk.f32.vlgmr.msra.gmra.mrb[76].mxu0 %vm591_vm1, %v8466_v41  ;;  %v8599_v26 = vpop.f32.mrb[48].mxu0 }
 0x14d   : > { %1586 = vmatprep.mubr.f32.mxu1 %v8268_v5  ;;  %v8602_v27 = vpop.f32.mrb[49].mxu0  ;;  %2439 = vmatprep.mubr.f32.mxu0 %v8268_v5 }
 0x150   : > { %8042 = vmatmul.mubr.msk.f32.vlgmr.msra.gmra.mrb[48].mxu1 %vm591_vm1, %v8466_v41  ;;  %v548_v28 = vpop.f32.mrb[50].mxu0  ;;  %8065 = vmatmul.mubr.msk.f32.gmra.mrb[78].mxu0 %vm591_vm1, %v8474_v44 }
 0x151   : > { %1600 = vmatpush1.msra.mxu1 %v8513_v3  ;;  %1592 = vmatprep.mubr.f32.mxu1 %v8268_v5  ;;  %v550_v29 = vpop.f32.mrb[51].mxu0 }
 0x152   : > { %1676 = vmatprep.subr.mxu1 %v8524_v7  ;;  %2523 = vmatprep.subr.mxu0 %v550_v29 }
 0x153   : > { %2524 = vmatpush1.msra.mxu0 %v548_v28  ;;  %2587 = vmatprep.mubr.f32.mxu0 %v8268_v5 }
 0x154   : > { %8043 = vmatmul.mubr.msk.f32.gmra.mrb[50].mxu1 %vm591_vm1, %v8474_v44  ;;  %8068 = vmatmul.mubr.msk.f32.vlgmr.msra.gmra.mrb[80].mxu0 %vm591_vm1, %v8466_v41  ;;  %v8617_v30 = vpop.f32.mrb[52].mxu0 }
 0x155   : > { %1663 = vmatprep.mubr.f32.mxu1 %v8268_v5  ;;  %v8620_v31 = vpop.f32.mrb[53].mxu0  ;;  %2593 = vmatprep.mubr.f32.mxu0 %v8268_v5 }
 0x158   : > { %8044 = vmatmul.mubr.msk.f32.vlgmr.msra.gmra.mrb[52].mxu1 %vm591_vm1, %v8466_v41  ;;  %v560_v32 = vpop.f32.mrb[54].mxu0  ;;  %8069 = vmatmul.mubr.msk.f32.gmra.mrb[82].mxu0 %vm591_vm1, %v8474_v44 }
 0x159   : > { %1677 = vmatpush1.msra.mxu1 %v8520_v6  ;;  %1669 = vmatprep.mubr.f32.mxu1 %v8268_v5  ;;  %v562_v33 = vpop.f32.mrb[55].mxu0  ;;  %v3132_v6 = vshrl.u32 %v3131_v60, 7 }
 0x15a   : > { %1753 = vmatprep.subr.mxu1 %v8531_v9  ;;  %2677 = vmatprep.subr.mxu0 %v562_v33 }
 0x15b   : > { %2678 = vmatpush1.msra.mxu0 %v560_v32  ;;  %2741 = vmatprep.mubr.f32.mxu0 %v8268_v5 }
 0x15c   : > { %8045 = vmatmul.mubr.msk.f32.gmra.mrb[54].mxu1 %vm591_vm1, %v8474_v44  ;;  %8072 = vmatmul.mubr.msk.f32.vlgmr.msra.gmra.mrb[84].mxu0 %vm591_vm1, %v8466_v41  ;;  %v8635_v34 = vpop.f32.mrb[56].mxu0 }
 0x15d   : > { %1740 = vmatprep.mubr.f32.mxu1 %v8268_v5  ;;  %v568_v35 = vpop.f32.mrb[57].mxu0  ;;  %2747 = vmatprep.mubr.f32.mxu0 %v8268_v5 }
 0x160   : > { %8046 = vmatmul.mubr.msk.f32.vlgmr.msra.gmra.mrb[56].mxu1 %vm591_vm1, %v8466_v41  ;;  %v572_v36 = vpop.f32.mrb[58].mxu0  ;;  %8073 = vmatmul.mubr.msk.f32.gmra.mrb[86].mxu0 %vm591_vm1, %v8474_v44 }
 0x161   : > { %1754 = vmatpush1.msra.mxu1 %v8527_v8  ;;  %1746 = vmatprep.mubr.f32.mxu1 %v8268_v5  ;;  %v574_v37 = vpop.f32.mrb[59].mxu0 }
 0x162   : > { %1830 = vmatprep.subr.mxu1 %v8538_v11  ;;  %2831 = vmatprep.subr.mxu0 %v574_v37 }
 0x163   : > { %2832 = vmatpush1.msra.mxu0 %v572_v36  ;;  %2895 = vmatprep.mubr.f32.mxu0 %v8268_v5 }
 0x164   : > { %8047 = vmatmul.mubr.msk.f32.gmra.mrb[58].mxu1 %vm591_vm1, %v8474_v44  ;;  %8076 = vmatmul.mubr.msk.f32.vlgmr.msra.gmra.mrb[88].mxu0 %vm591_vm1, %v8466_v41  ;;  %v578_v38 = vpop.f32.mrb[60].mxu0 }
 0x165   : > { %1817 = vmatprep.mubr.f32.mxu1 %v8268_v5  ;;  %v580_v39 = vpop.f32.mrb[61].mxu0  ;;  %2901 = vmatprep.mubr.f32.mxu0 %v8268_v5 }
 0x168   : > { %8048 = vmatmul.mubr.msk.f32.vlgmr.msra.gmra.mrb[60].mxu1 %vm591_vm1, %v8466_v41  ;;  %v584_v40 = vpop.f32.mrb[62].mxu0  ;;  %8077 = vmatmul.mubr.msk.f32.gmra.mrb[90].mxu0 %vm591_vm1, %v8474_v44 }
 0x169   : > { %1831 = vmatpush1.msra.mxu1 %v8534_v10  ;;  %1823 = vmatprep.mubr.f32.mxu1 %v8268_v5  ;;  %v586_v42 = vpop.f32.mrb[63].mxu0 }
 0x16a   : > { %1984 = vmatprep.subr.mxu1 %v8551_v15  ;;  %2985 = vmatprep.subr.mxu0 %v586_v42 }
 0x16b   : > { %2986 = vmatpush1.msra.mxu0 %v584_v40  ;;  %3049 = vmatprep.mubr.f32.mxu0 %v8268_v5 }
 0x16c   : > { %8049 = vmatmul.mubr.msk.f32.gmra.mrb[62].mxu1 %vm591_vm1, %v8474_v44  ;;  %8080 = vmatmul.mubr.msk.f32.vlgmr.msra.gmra.mrb[92].mxu0 %vm591_vm1, %v8466_v41 }
 0x16d   : > { %1894 = vmatprep.mubr.f32.mxu1 %v8268_v5  ;;  %3055 = vmatprep.mubr.f32.mxu0 %v8268_v5 }
 0x170   : > { %8050 = vmatmul.mubr.msk.f32.vlgmr.msra.gmra.mrb[64].mxu1 %vm591_vm1, %v8466_v41  ;;  %8081 = vmatmul.mubr.msk.f32.gmra.mrb[94].mxu0 %vm591_vm1, %v8474_v44 }
 0x171   : > { %1900 = vmatprep.mubr.f32.mxu1 %v8268_v5  ;;  %1985 = vmatpush1.msra.mxu1 %v8548_v14 }
 0x172   : > { %2138 = vmatprep.subr.mxu1 %v8567_v19  ;;  %4363 = vmatprep.mubr.f32.mxu0 %v8268_v5 }
 0x174   : > { %8051 = vmatmul.mubr.msk.f32.gmra.mrb[66].mxu1 %vm591_vm1, %v8474_v44 }
 0x175   : > { %2048 = vmatprep.mubr.f32.mxu1 %v8268_v5 }
 0x178   : > { %8054 = vmatmul.mubr.msk.f32.vlgmr.msra.gmra.mrb[68].mxu1 %vm591_vm1, %v8466_v41 }
 0x179   : > { %2054 = vmatprep.mubr.f32.mxu1 %v8268_v5  ;;  %2139 = vmatpush1.msra.mxu1 %v8564_v18 }
 0x17a   : > { %2292 = vmatprep.subr.mxu1 %v8584_v23 }
 0x17c   : > { %8055 = vmatmul.mubr.msk.f32.gmra.mrb[70].mxu1 %vm591_vm1, %v8474_v44 }
 0x17d   : > { %2202 = vmatprep.mubr.f32.mxu1 %v8268_v5 }
 0x180   : > { %8058 = vmatmul.mubr.msk.f32.vlgmr.msra.gmra.mrb[72].mxu1 %vm591_vm1, %v8466_v41 }
 0x181   : > { %2208 = vmatprep.mubr.f32.mxu1 %v8268_v5  ;;  %2293 = vmatpush1.msra.mxu1 %v8581_v22 }
 0x182   : > { %2446 = vmatprep.subr.mxu1 %v8602_v27 }
 0x184   : > { %8059 = vmatmul.mubr.msk.f32.gmra.mrb[74].mxu1 %vm591_vm1, %v8474_v44 }
 0x185   : > { %2356 = vmatprep.mubr.f32.mxu1 %v8268_v5 }
 0x188   : > { %8062 = vmatmul.mubr.msk.f32.vlgmr.msra.gmra.mrb[76].mxu1 %vm591_vm1, %v8466_v41 }
 0x189   : > { %2362 = vmatprep.mubr.f32.mxu1 %v8268_v5  ;;  %2447 = vmatpush1.msra.mxu1 %v8599_v26 }
 0x18a   : > { %2600 = vmatprep.subr.mxu1 %v8620_v31 }
 0x18c   : > { %8063 = vmatmul.mubr.msk.f32.gmra.mrb[78].mxu1 %vm591_vm1, %v8474_v44 }
 0x18d   : > { %2510 = vmatprep.mubr.f32.mxu1 %v8268_v5 }
 0x190   : > { %8066 = vmatmul.mubr.msk.f32.vlgmr.msra.gmra.mrb[80].mxu1 %vm591_vm1, %v8466_v41 }
 0x191   : > { %2516 = vmatprep.mubr.f32.mxu1 %v8268_v5  ;;  %2601 = vmatpush1.msra.mxu1 %v8617_v30 }
 0x192   : > { %2754 = vmatprep.subr.mxu1 %v568_v35 }
 0x194   : > { %8067 = vmatmul.mubr.msk.f32.gmra.mrb[82].mxu1 %vm591_vm1, %v8474_v44 }
 0x195   : > { %2664 = vmatprep.mubr.f32.mxu1 %v8268_v5 }
 0x198   : > { %8070 = vmatmul.mubr.msk.f32.vlgmr.msra.gmra.mrb[84].mxu1 %vm591_vm1, %v8466_v41 }
 0x199   : > { %2670 = vmatprep.mubr.f32.mxu1 %v8268_v5  ;;  %2755 = vmatpush1.msra.mxu1 %v8635_v34 }
 0x19a   : > { %2908 = vmatprep.subr.mxu1 %v580_v39 }
 0x19c   : > { %8071 = vmatmul.mubr.msk.f32.gmra.mrb[86].mxu1 %vm591_vm1, %v8474_v44 }
 0x19d   : > { %2818 = vmatprep.mubr.f32.mxu1 %v8268_v5 }
 0x1a0   : > { %8074 = vmatmul.mubr.msk.f32.vlgmr.msra.gmra.mrb[88].mxu1 %vm591_vm1, %v8466_v41 }
 0x1a1   : > { %2824 = vmatprep.mubr.f32.mxu1 %v8268_v5  ;;  %2909 = vmatpush1.msra.mxu1 %v578_v38 }
 0x1a4   : > { %8075 = vmatmul.mubr.msk.f32.gmra.mrb[90].mxu1 %vm591_vm1, %v8474_v44 }
 0x1a5   : > { %2972 = vmatprep.mubr.f32.mxu1 %v8268_v5 }
 0x1a8   : > { %8078 = vmatmul.mubr.msk.f32.vlgmr.msra.gmra.mrb[92].mxu1 %vm591_vm1, %v8466_v41 }
 0x1a9   : > { %2978 = vmatprep.mubr.f32.mxu1 %v8268_v5 }
 0x1ac   : > { %8079 = vmatmul.mubr.msk.f32.gmra.mrb[94].mxu1 %vm591_vm1, %v8474_v44  ;;  %v3129_v44 = vunpack.c.l.s4 %v8269_v59 }
 0x1ad   : > { %4286 = vmatprep.mubr.f32.mxu1 %v8268_v5 }
 0x1ae   : > { %v3130_v4 = vunpack.c.0.s8 %v3129_v44 }
 0x1b0   : > { %v8728_v9 = vsub.s32 %v3130_v4, %v3132_v6 }
 0x1c3   : > { %v664_v43 = vpop.f32.mrb[0].mxu1 }
 0x1c4   : > { %v666_v45 = vpop.f32.mrb[1].mxu1 }
 0x1c7   : > { %v670_v46 = vpop.f32.mrb[2].mxu1 }
 0x1c8   : > { %v3094_v47 = vadd.f32 %v670_v46, %v666_v45  ;;  %v672_v48 = vpop.f32.mrb[3].mxu1 }
 0x1c9   : > { %v3062_v49 = vsub.f32 %v664_v43, %v672_v48  ;;  %v8270_v48 = vmov 1934713408  }
 0x1cb   : > { %v741_v50 = vpop.f32.mrb[4].mxu1 }
 0x1cc   : > { %v743_v51 = vpop.f32.mrb[5].mxu1 }
 0x1cf   : > { %v747_v52 = vpop.f32.mrb[6].mxu1 }
 0x1d0   : > { %v3095_v53 = vadd.f32 %v747_v52, %v743_v51  ;;  %v749_v54 = vpop.f32.mrb[7].mxu1 }
 0x1d1   : > { %v3063_v55 = vsub.f32 %v741_v50, %v749_v54 }
 0x1d3   : > { %v818_v41 = vpop.f32.mrb[8].mxu1 }
 0x1d4   : > { %v820_v56 = vpop.f32.mrb[9].mxu1 }
 0x1d7   : > { %v824_v57 = vpop.f32.mrb[10].mxu1 }
 0x1d8   : > { %v3096_v58 = vadd.f32 %v824_v57, %v820_v56  ;;  %v826_v61 = vpop.f32.mrb[11].mxu1 }
 0x1d9   : > { %v3064_v62 = vsub.f32 %v818_v41, %v826_v61 }
 0x1da   : > { %v3262_v63 = vcombine.low %v3094_v47, %v3096_v58  ;;  %v3263_v0 = vcombine.high %v3094_v47, %v3096_v58 }
 0x1db   : > { %v3126_v1 = vcombine.low %v3062_v49, %v3064_v62  ;;  %v3127_v2 = vcombine.high %v3062_v49, %v3064_v62  ;;  %v895_v3 = vpop.f32.mrb[12].mxu1  ;;  %v3193_v49 = vunpack.c.l.s4 %v8270_v48 }
 0x1dc   : > { %v897_v7 = vpop.f32.mrb[13].mxu1  ;;  %v3270_v18 = vrot.slane %v3262_v63, %v8728_v9  ;;  %v3277_v19 = vrot.slane %v3263_v0, %v8728_v9 }
 0x1dd   : > { %v3134_v23 = vrot.slane %v3126_v1, %v8728_v9  ;;  %v3141_v24 = vrot.slane %v3127_v2, %v8728_v9  ;;  %v3194_v52 = vunpack.c.0.s8 %v3193_v49 }
 0x1df   : > { %v901_v8 = vpop.f32.mrb[14].mxu1  ;;  %v8738_v44 = vsub.s32 %v3194_v52, %v3132_v6 }
 0x1e0   : > { %v3097_v10 = vadd.f32 %v901_v8, %v897_v7  ;;  %v903_v11 = vpop.f32.mrb[15].mxu1 }
 0x1e1   : > { %v3065_v12 = vsub.f32 %v895_v3, %v903_v11 }
 0x1e2   : > { %v3278_v13 = vcombine.low %v3095_v53, %v3097_v10  ;;  %v3279_v14 = vcombine.high %v3095_v53, %v3097_v10 }
 0x1e3   : > { %v3142_v15 = vcombine.low %v3063_v55, %v3065_v12  ;;  %v3143_v16 = vcombine.high %v3063_v55, %v3065_v12  ;;  %v972_v17 = vpop.f32.mrb[16].mxu1 }
 0x1e4   : > { %v3286_v20 = vrot.slane %v3278_v13, %v8728_v9  ;;  %v3293_v21 = vrot.slane %v3279_v14, %v8728_v9  ;;  %v974_v22 = vpop.f32.mrb[17].mxu1 }
 0x1e5   : > { %v3150_v25 = vrot.slane %v3142_v15, %v8728_v9  ;;  %v3157_v26 = vrot.slane %v3143_v16, %v8728_v9 }
 0x1e6   : > { %v3326_v27 = vcombine.low %v3270_v18, %v3286_v20  ;;  %v3327_v28 = vcombine.high %v3270_v18, %v3286_v20  ;;  %v3342_v29 = vcombine.low %v3277_v19, %v3293_v21  ;;  %v3343_v30 = vcombine.high %v3277_v19, %v3293_v21 }
 0x1e7   : > { %v3190_v31 = vcombine.low %v3134_v23, %v3150_v25  ;;  %v3191_v32 = vcombine.high %v3134_v23, %v3150_v25  ;;  %v3206_v33 = vcombine.low %v3141_v24, %v3157_v26  ;;  %v3207_v34 = vcombine.high %v3141_v24, %v3157_v26  ;;  %v978_v35 = vpop.f32.mrb[18].mxu1 }
 0x1e8   : > { %v3098_v36 = vadd.f32 %v978_v35, %v974_v22  ;;  %v980_v37 = vpop.f32.mrb[19].mxu1  ;;  %v3334_v0 = vrot.slane %v3326_v27, %v8738_v44  ;;  %v8743_v3 = vrot.slane %v3327_v28, %v8738_v44  ;;  %v8746_v4 = vrot.slane %v3342_v29, %v8738_v44 }
 0x1e9   : > { %v3066_v38 = vsub.f32 %v972_v17, %v980_v37  ;;  %v3198_v1 = vrot.slane %v3190_v31, %v8738_v44  ;;  %v8749_v7 = vrot.slane %v3191_v32, %v8738_v44  ;;  %v8752_v6 = vrot.slane %v3206_v33, %v8738_v44 }
 0x1ea   : > { %v8755_v11 = vrot.slane %v3207_v34, %v8738_v44  ;;  %v8758_v14 = vrot.slane %v3343_v30, %v8738_v44 }
 0x1eb   : > { %v1049_v39 = vpop.f32.mrb[20].mxu1 }
 0x1ec   : > { %v1051_v40 = vpop.f32.mrb[21].mxu1 }
 0x1ef   : > { %v1055_v42 = vpop.f32.mrb[22].mxu1 }
 0x1f0   : > { %v3099_v43 = vadd.f32 %v1055_v42, %v1051_v40  ;;  %v1057_v45 = vpop.f32.mrb[23].mxu1 }
 0x1f1   : > { %v3067_v46 = vsub.f32 %v1049_v39, %v1057_v45 }
 0x1f3   : > { %v1126_v47 = vpop.f32.mrb[24].mxu1 }
 0x1f4   : > { %v1128_v50 = vpop.f32.mrb[25].mxu1 }
 0x1f7   : > { %v1132_v51 = vpop.f32.mrb[26].mxu1 }
 0x1f8   : > { %v3100_v53 = vadd.f32 %v1132_v51, %v1128_v50  ;;  %v1134_v54 = vpop.f32.mrb[27].mxu1 }
 0x1f9   : > { %v3068_v55 = vsub.f32 %v1126_v47, %v1134_v54 }
 0x1fa   : > { %v3294_v41 = vcombine.low %v3098_v36, %v3100_v53  ;;  %v3295_v56 = vcombine.high %v3098_v36, %v3100_v53  ;;  %v8787_v53 = vld [vmem:[%s9781_s3] sm:$0xff] }
 0x1fb   : > { %v3158_v57 = vcombine.low %v3066_v38, %v3068_v55  ;;  %v3159_v58 = vcombine.high %v3066_v38, %v3068_v55  ;;  %v1203_v59 = vpop.f32.mrb[28].mxu1 }
 0x1fc   : > { %v1205_v60 = vpop.f32.mrb[29].mxu1  ;;  %v3302_v16 = vrot.slane %v3294_v41, %v8728_v9  ;;  %v3309_v17 = vrot.slane %v3295_v56, %v8728_v9 }
 0x1fd   : > { %v3166_v21 = vrot.slane %v3158_v57, %v8728_v9  ;;  %v3173_v22 = vrot.slane %v3159_v58, %v8728_v9 }
 0x1ff   : > { %v1209_v61 = vpop.f32.mrb[30].mxu1 }
 0x200   : > { %v3101_v62 = vadd.f32 %v1209_v61, %v1205_v60  ;;  %v1211_v63 = vpop.f32.mrb[31].mxu1 }
 0x201   : > { %v3069_v2 = vsub.f32 %v1203_v59, %v1211_v63 }
 0x202   : > { %v3310_v8 = vcombine.low %v3099_v43, %v3101_v62  ;;  %v3311_v10 = vcombine.high %v3099_v43, %v3101_v62 }
 0x203   : > { %v3174_v12 = vcombine.low %v3067_v46, %v3069_v2  ;;  %v3175_v13 = vcombine.high %v3067_v46, %v3069_v2  ;;  %v1280_v15 = vpop.f32.mrb[32].mxu1 }
 0x204   : > { %v3318_v18 = vrot.slane %v3310_v8, %v8728_v9  ;;  %v3325_v19 = vrot.slane %v3311_v10, %v8728_v9  ;;  %v1282_v20 = vpop.f32.mrb[33].mxu1 }
 0x205   : > { %v3182_v23 = vrot.slane %v3174_v12, %v8728_v9  ;;  %v3189_v24 = vrot.slane %v3175_v13, %v8728_v9  ;;  %v8820_v12 = vld [vmem:[%s9781_s3 + $0x8] sm:$0xff] }
 0x206   : > { %v3358_v25 = vcombine.low %v3302_v16, %v3318_v18  ;;  %v3359_v26 = vcombine.high %v3302_v16, %v3318_v18  ;;  %v3374_v27 = vcombine.low %v3309_v17, %v3325_v19  ;;  %v3375_v28 = vcombine.high %v3309_v17, %v3325_v19 }
 0x207   : > { %v3222_v29 = vcombine.low %v3166_v21, %v3182_v23  ;;  %v3223_v30 = vcombine.high %v3166_v21, %v3182_v23  ;;  %v3238_v31 = vcombine.low %v3173_v22, %v3189_v24  ;;  %v3239_v32 = vcombine.high %v3173_v22, %v3189_v24  ;;  %v1286_v33 = vpop.f32.mrb[34].mxu1  ;;  %v1973_v34 = vpop.f32.mrb[64].mxu0 }
 0x208   : > { %v3366_v35 = vrot.slane %v3358_v25, %v8738_v44  ;;  %v3373_v36 = vrot.slane %v3359_v26, %v8738_v44  ;;  %v3382_v37 = vrot.slane %v3374_v27, %v8738_v44  ;;  %v8772_v38 = vrot.slane %v3375_v28, %v8738_v44  ;;  %v1288_v39 = vpop.f32.mrb[35].mxu1  ;;  %v1975_v40 = vpop.f32.mrb[65].mxu0 }
 0x209   : > { %v3230_v42 = vrot.slane %v3222_v29, %v8738_v44  ;;  %v3237_v43 = vrot.slane %v3223_v30, %v8738_v44  ;;  %v8777_v45 = vrot.slane %v3238_v31, %v8738_v44  ;;  %v8780_v46 = vrot.slane %v3239_v32, %v8738_v44 }
 0x20a   : > { %v3390_v47 = vcombine.low %v3334_v0, %v3366_v35  ;;  %v3391_v48 = vcombine.high %v3334_v0, %v3366_v35  ;;  %v3392_v49 = vcombine.low %v8743_v3, %v3373_v36  ;;  %v3393_v50 = vcombine.high %v8743_v3, %v3373_v36 }
 0x20b   : > { %v3254_v51 = vcombine.low %v3198_v1, %v3230_v42  ;;  %v3255_v52 = vcombine.high %v3198_v1, %v3230_v42  ;;  %v3256_v54 = vcombine.low %v8749_v7, %v3237_v43  ;;  %v3257_v55 = vcombine.high %v8749_v7, %v3237_v43  ;;  %v1357_v41 = vpop.f32.mrb[36].mxu1  ;;  %v1979_v56 = vpop.f32.mrb[66].mxu0 }
 0x20c   : > { %4222 = vmatprep.subr.mxu1 %v3390_v47  ;;  %4299 = vmatprep.subr.mxu0 %v3391_v48  ;;  %v3394_v57 = vcombine.low %v8746_v4, %v3382_v37  ;;  %v3395_v58 = vcombine.high %v8746_v4, %v3382_v37  ;;  %v3258_v59 = vcombine.low %v8752_v6, %v8777_v45  ;;  %v1359_v60 = vpop.f32.mrb[37].mxu1  ;;  %v1981_v61 = vpop.f32.mrb[67].mxu0 }
 0x20d   : > { %4223 = vmatpush1.msra.mxu1 %v3254_v51  ;;  %4300 = vmatpush1.msra.mxu0 %v3255_v52  ;;  %v3259_v62 = vcombine.high %v8752_v6, %v8777_v45  ;;  %v3396_v63 = vcombine.low %v8758_v14, %v8772_v38  ;;  %v3397_v0 = vcombine.high %v8758_v14, %v8772_v38 }
 0x20e   : > { %8082 = vmatmul.mubr.msk.f32.vlgmr.msra.gmra.mrb[96].mxu1 %vm591_vm1, %v8787_v53  ;;  %8084 = vmatmul.mubr.msk.f32.vlgmr.msra.gmra.mrb[96].mxu0 %vm591_vm1, %v8787_v53  ;;  %v3260_v1 = vcombine.low %v8755_v11, %v8780_v46  ;;  %v3261_v2 = vcombine.high %v8755_v11, %v8780_v46  ;;  %v8809_v3 = vadd.f32 %v1286_v33, %v1282_v20 }
 0x20f   : > { %4376 = vmatprep.subr.mxu1 %v3392_v49  ;;  %4453 = vmatprep.subr.mxu0 %v3393_v50  ;;  %v8811_v4 = vsub.f32 %v1280_v15, %v1288_v39  ;;  %v1363_v7 = vpop.f32.mrb[38].mxu1  ;;  %v8813_v6 = vadd.f32 %v1979_v56, %v1975_v40  ;;  %v8815_v8 = vsub.f32 %v1973_v34, %v1981_v61  ;;  %v2127_v10 = vpop.f32.mrb[68].mxu0 }
 0x210   : > { %4377 = vmatpush1.msra.mxu1 %v3256_v54  ;;  %4454 = vmatpush1.msra.mxu0 %v3257_v55  ;;  %v8822_v13 = vadd.f32 %v1363_v7, %v1359_v60  ;;  %v1365_v14 = vpop.f32.mrb[39].mxu1  ;;  %v2129_v16 = vpop.f32.mrb[69].mxu0 }
 0x211   : > { %4530 = vmatprep.subr.mxu1 %v3394_v57  ;;  %4607 = vmatprep.subr.mxu0 %v3395_v58  ;;  %v8824_v15 = vsub.f32 %v1357_v41, %v1365_v14 }
 0x212   : > { %4292 = vmatprep.mubr.f32.mxu1 %v8268_v5  ;;  %4369 = vmatprep.mubr.f32.mxu0 %v8268_v5 }
 0x213   : > { %8083 = vmatmul.mubr.msk.f32.gmra.mrb[98].mxu1 %vm591_vm1, %v8820_v12  ;;  %8085 = vmatmul.mubr.msk.f32.gmra.mrb[98].mxu0 %vm591_vm1, %v8820_v12  ;;  %v1434_v17 = vpop.f32.mrb[40].mxu1  ;;  %v2133_v18 = vpop.f32.mrb[70].mxu0 }
 0x214   : > { %4440 = vmatprep.mubr.f32.mxu1 %v8268_v5  ;;  %4517 = vmatprep.mubr.f32.mxu0 %v8268_v5  ;;  %v1436_v19 = vpop.f32.mrb[41].mxu1  ;;  %v8834_v20 = vadd.f32 %v2133_v18, %v2129_v16  ;;  %v2135_v21 = vpop.f32.mrb[71].mxu0 }
 0x215   : > { %v8836_v22 = vsub.f32 %v2127_v10, %v2135_v21 }
 0x216   : > { %v3822_v23 = vcombine.low %v8813_v6, %v8834_v20  ;;  %v3823_v24 = vcombine.high %v8813_v6, %v8834_v20 }
 0x217   : > { %8086 = vmatmul.mubr.msk.f32.vlgmr.msra.gmra.mrb[100].mxu1 %vm591_vm1, %v8787_v53  ;;  %8088 = vmatmul.mubr.msk.f32.vlgmr.msra.gmra.mrb[100].mxu0 %vm591_vm1, %v8787_v53  ;;  %v1440_v25 = vpop.f32.mrb[42].mxu1  ;;  %v3686_v26 = vcombine.low %v8815_v8, %v8836_v22  ;;  %v3687_v27 = vcombine.high %v8815_v8, %v8836_v22  ;;  %v2281_v28 = vpop.f32.mrb[72].mxu0 }
 0x218   : > { %4531 = vmatpush1.msra.mxu1 %v3258_v59  ;;  %4608 = vmatpush1.msra.mxu0 %v3259_v62  ;;  %v3104_v29 = vadd.f32 %v1440_v25, %v1436_v19  ;;  %v1442_v30 = vpop.f32.mrb[43].mxu1  ;;  %v2283_v31 = vpop.f32.mrb[73].mxu0 }
 0x219   : > { %4684 = vmatprep.subr.mxu1 %v3396_v63  ;;  %4761 = vmatprep.subr.mxu0 %v3397_v0  ;;  %v3072_v32 = vsub.f32 %v1434_v17, %v1442_v30 }
 0x21a   : > { %4446 = vmatprep.mubr.f32.mxu1 %v8268_v5  ;;  %4523 = vmatprep.mubr.f32.mxu0 %v8268_v5  ;;  %v3534_v33 = vcombine.low %v8809_v3, %v3104_v29  ;;  %v3535_v34 = vcombine.high %v8809_v3, %v3104_v29 }
 0x21b   : > { %8087 = vmatmul.mubr.msk.f32.gmra.mrb[102].mxu1 %vm591_vm1, %v8820_v12  ;;  %8089 = vmatmul.mubr.msk.f32.gmra.mrb[102].mxu0 %vm591_vm1, %v8820_v12  ;;  %v3398_v35 = vcombine.low %v8811_v4, %v3072_v32  ;;  %v3399_v36 = vcombine.high %v8811_v4, %v3072_v32  ;;  %v1511_v37 = vpop.f32.mrb[44].mxu1  ;;  %v2287_v38 = vpop.f32.mrb[74].mxu0 }
 0x21c   : > { %4594 = vmatprep.mubr.f32.mxu1 %v8268_v5  ;;  %4671 = vmatprep.mubr.f32.mxu0 %v8268_v5  ;;  %v1513_v39 = vpop.f32.mrb[45].mxu1  ;;  %v8862_v40 = vadd.f32 %v2287_v38, %v2283_v31  ;;  %v2289_v42 = vpop.f32.mrb[75].mxu0  ;;  %v8879_v52 = vrot.slane %v3534_v33, %v8728_v9  ;;  %v8882_v54 = vrot.slane %v3535_v34, %v8728_v9 }
 0x21d   : > { %v8864_v43 = vsub.f32 %v2281_v28, %v2289_v42  ;;  %v8887_v11 = vrot.slane %v3398_v35, %v8728_v9  ;;  %v8906_v0 = vrot.slane %v3399_v36, %v8728_v9 }
 0x21f   : > { %8090 = vmatmul.mubr.msk.f32.vlgmr.msra.gmra.mrb[104].mxu1 %vm591_vm1, %v8787_v53  ;;  %8092 = vmatmul.mubr.msk.f32.vlgmr.msra.gmra.mrb[104].mxu0 %vm591_vm1, %v8787_v53  ;;  %v1517_v45 = vpop.f32.mrb[46].mxu1  ;;  %v2435_v47 = vpop.f32.mrb[76].mxu0 }
 0x220   : > { %4685 = vmatpush1.msra.mxu1 %v3260_v1  ;;  %4762 = vmatpush1.msra.mxu0 %v3261_v2  ;;  %v3105_v48 = vadd.f32 %v1517_v45, %v1513_v39  ;;  %v1519_v49 = vpop.f32.mrb[47].mxu1  ;;  %v2437_v50 = vpop.f32.mrb[77].mxu0 }
 0x221   : > { %v3073_v51 = vsub.f32 %v1511_v37, %v1519_v49  ;;  %4600 = vmatprep.mubr.f32.mxu1 %v8268_v5  ;;  %4677 = vmatprep.mubr.f32.mxu0 %v8268_v5 }
 0x222   : > { %v3550_v55 = vcombine.low %v8822_v13, %v3105_v48  ;;  %v3551_v41 = vcombine.high %v8822_v13, %v3105_v48 }
 0x223   : > { %v3414_v46 = vcombine.low %v8824_v15, %v3073_v51  ;;  %v3415_v56 = vcombine.high %v8824_v15, %v3073_v51  ;;  %v1588_v57 = vpop.f32.mrb[48].mxu1  ;;  %8091 = vmatmul.mubr.msk.f32.gmra.mrb[106].mxu1 %vm591_vm1, %v8820_v12  ;;  %8093 = vmatmul.mubr.msk.f32.gmra.mrb[106].mxu0 %vm591_vm1, %v8820_v12  ;;  %v2441_v58 = vpop.f32.mrb[78].mxu0 }
 0x224   : > { %v8896_v59 = vrot.slane %v3550_v55, %v8728_v9  ;;  %v8899_v60 = vrot.slane %v3551_v41, %v8728_v9  ;;  %v1590_v61 = vpop.f32.mrb[49].mxu1  ;;  %4748 = vmatprep.mubr.f32.mxu1 %v8268_v5  ;;  %4825 = vmatprep.mubr.f32.mxu0 %v8268_v5  ;;  %v8903_v62 = vadd.f32 %v2441_v58, %v2437_v50  ;;  %v2443_v63 = vpop.f32.mrb[79].mxu0 }
 0x225   : > { %v8909_v1 = vrot.slane %v3414_v46, %v8728_v9  ;;  %v8912_v2 = vrot.slane %v3415_v56, %v8728_v9  ;;  %v8914_v3 = vsub.f32 %v2435_v47, %v2443_v63 }
 0x226   : > { %v3598_v4 = vcombine.low %v8879_v52, %v8896_v59  ;;  %v3599_v7 = vcombine.high %v8879_v52, %v8896_v59  ;;  %v3614_v10 = vcombine.low %v8882_v54, %v8899_v60  ;;  %v3615_v13 = vcombine.high %v8882_v54, %v8899_v60 }
 0x227   : > { %v3462_v14 = vcombine.low %v8887_v11, %v8909_v1  ;;  %v3463_v16 = vcombine.high %v8887_v11, %v8909_v1  ;;  %v3478_v15 = vcombine.low %v8906_v0, %v8912_v2  ;;  %v3479_v17 = vcombine.high %v8906_v0, %v8912_v2  ;;  %v1594_v18 = vpop.f32.mrb[50].mxu1  ;;  %8094 = vmatmul.mubr.msk.f32.vlgmr.msra.gmra.mrb[108].mxu1 %vm591_vm1, %v8787_v53  ;;  %v2589_v19 = vpop.f32.mrb[80].mxu0 }
 0x228   : > { %v8934_v21 = vadd.f32 %v1594_v18, %v1590_v61  ;;  %v1596_v25 = vpop.f32.mrb[51].mxu1  ;;  %8096 = vmatmul.mubr.msk.f32.vlgmr.msra.gmra.mrb[108].mxu0 %vm591_vm1, %v8787_v53  ;;  %4754 = vmatprep.mubr.f32.mxu1 %v8268_v5  ;;  %v2591_v28 = vpop.f32.mrb[81].mxu0  ;;  %v3854_v30 = vcombine.low %v8862_v40, %v8903_v62  ;;  %v3855_v32 = vcombine.high %v8862_v40, %v8903_v62 }
 0x229   : > { %4831 = vmatprep.mubr.f32.mxu0 %v8268_v5  ;;  %v8940_v29 = vsub.f32 %v1588_v57, %v1596_v25  ;;  %v3718_v33 = vcombine.low %v8864_v43, %v8914_v3  ;;  %v3719_v34 = vcombine.high %v8864_v43, %v8914_v3  ;;  %v9009_v52 = vrot.slane %v3479_v17, %v8738_v44 }
 0x22a   : > { %v9015_v11 = vrot.slane %v3614_v10, %v8738_v44  ;;  %v9021_v1 = vrot.slane %v3615_v13, %v8738_v44 }
 0x22b   : > { %v1665_v31 = vpop.f32.mrb[52].mxu1  ;;  %8095 = vmatmul.mubr.msk.f32.gmra.mrb[110].mxu1 %vm591_vm1, %v8820_v12  ;;  %v2595_v35 = vpop.f32.mrb[82].mxu0  ;;  %v3733_v40 = vrot.slane %v3719_v34, %v8728_v9 }
 0x22c   : > { %v1667_v36 = vpop.f32.mrb[53].mxu1  ;;  %8097 = vmatmul.mubr.msk.f32.gmra.mrb[110].mxu0 %vm591_vm1, %v8820_v12  ;;  %4902 = vmatprep.mubr.f32.mxu1 %v8268_v5  ;;  %v8955_v37 = vadd.f32 %v2595_v35, %v2591_v28  ;;  %v2597_v38 = vpop.f32.mrb[83].mxu0 }
 0x22d   : > { %4979 = vmatprep.mubr.f32.mxu0 %v8268_v5  ;;  %v8958_v39 = vsub.f32 %v2589_v19, %v2597_v38 }
 0x22f   : > { %v1671_v42 = vpop.f32.mrb[54].mxu1  ;;  %v2743_v45 = vpop.f32.mrb[84].mxu0 }
 0x230   : > { %v3107_v47 = vadd.f32 %v1671_v42, %v1667_v36  ;;  %v1673_v48 = vpop.f32.mrb[55].mxu1  ;;  %v2745_v49 = vpop.f32.mrb[85].mxu0 }
 0x231   : > { %v3075_v50 = vsub.f32 %v1665_v31, %v1673_v48 }
 0x233   : > { %v1742_v51 = vpop.f32.mrb[56].mxu1  ;;  %v2749_v55 = vpop.f32.mrb[86].mxu0 }
 0x234   : > { %v1744_v41 = vpop.f32.mrb[57].mxu1  ;;  %v8960_v46 = vadd.f32 %v2749_v55, %v2745_v49  ;;  %v2751_v56 = vpop.f32.mrb[87].mxu0 }
 0x235   : > { %v8962_v57 = vsub.f32 %v2743_v45, %v2751_v56 }
 0x237   : > { %v1748_v63 = vpop.f32.mrb[58].mxu1  ;;  %v2897_v25 = vpop.f32.mrb[88].mxu0 }
 0x238   : > { %v3108_v28 = vadd.f32 %v1748_v63, %v1744_v41  ;;  %v1750_v31 = vpop.f32.mrb[59].mxu1  ;;  %v2899_v35 = vpop.f32.mrb[89].mxu0 }
 0x239   : > { %v3076_v36 = vsub.f32 %v1742_v51, %v1750_v31  ;;  %v8981_v51 = vrot.slane %v3462_v14, %v8738_v44  ;;  %v8997_v14 = vrot.slane %v3463_v16, %v8738_v44 }
 0x23a   : > { %v3566_v38 = vcombine.low %v8934_v21, %v3108_v28  ;;  %v3567_v42 = vcombine.high %v8934_v21, %v3108_v28  ;;  %v3606_v21 = vrot.slane %v3598_v4, %v8738_v44 }
 0x23b   : > { %v3430_v45 = vcombine.low %v8940_v29, %v3076_v36  ;;  %v3431_v48 = vcombine.high %v8940_v29, %v3076_v36  ;;  %v1819_v49 = vpop.f32.mrb[60].mxu1  ;;  %v2903_v55 = vpop.f32.mrb[90].mxu0  ;;  %v8991_v29 = vrot.slane %v3599_v7, %v8738_v44 }
 0x23c   : > { %v1821_v56 = vpop.f32.mrb[61].mxu1  ;;  %v8976_v18 = vadd.f32 %v2903_v55, %v2899_v35  ;;  %v2905_v61 = vpop.f32.mrb[91].mxu0  ;;  %v3574_v16 = vrot.slane %v3566_v38, %v8728_v9  ;;  %v3581_v0 = vrot.slane %v3567_v42, %v8728_v9 }
 0x23d   : > { %v8978_v19 = vsub.f32 %v2897_v25, %v2905_v61  ;;  %v9003_v25 = vrot.slane %v3478_v15, %v8738_v44  ;;  %v3445_v60 = vrot.slane %v3431_v48, %v8728_v9 }
 0x23f   : > { %v1825_v41 = vpop.f32.mrb[62].mxu1  ;;  %v3051_v63 = vpop.f32.mrb[92].mxu0 }
 0x240   : > { %v3109_v31 = vadd.f32 %v1825_v41, %v1821_v56  ;;  %v1827_v58 = vpop.f32.mrb[63].mxu1  ;;  %v3053_v61 = vpop.f32.mrb[93].mxu0 }
 0x241   : > { %v3077_v59 = vsub.f32 %v1819_v49, %v1827_v58  ;;  %v3438_v58 = vrot.slane %v3430_v45, %v8728_v9 }
 0x242   : > { %v3582_v4 = vcombine.low %v3107_v47, %v3109_v31  ;;  %v3583_v7 = vcombine.high %v3107_v47, %v3109_v31 }
 0x243   : > { %v3446_v2 = vcombine.low %v3075_v50, %v3077_v59  ;;  %v3447_v15 = vcombine.high %v3075_v50, %v3077_v59  ;;  %v1896_v17 = vpop.f32.mrb[64].mxu1  ;;  %v3057_v47 = vpop.f32.mrb[94].mxu0 }
 0x244   : > { %v3590_v28 = vrot.slane %v3582_v4, %v8728_v9  ;;  %v3597_v10 = vrot.slane %v3583_v7, %v8728_v9  ;;  %v1898_v35 = vpop.f32.mrb[65].mxu1  ;;  %v9028_v36 = vadd.f32 %v3057_v47, %v3053_v61  ;;  %v3059_v54 = vpop.f32.mrb[95].mxu0 }
 0x245   : > { %v3454_v13 = vrot.slane %v3446_v2, %v8728_v9  ;;  %v3461_v38 = vrot.slane %v3447_v15, %v8728_v9  ;;  %v9033_v42 = vsub.f32 %v3051_v63, %v3059_v54 }
 0x246   : > { %v3630_v50 = vcombine.low %v3574_v16, %v3590_v28  ;;  %v3631_v49 = vcombine.high %v3574_v16, %v3590_v28  ;;  %v3646_v55 = vcombine.low %v3581_v0, %v3597_v10  ;;  %v3647_v45 = vcombine.high %v3581_v0, %v3597_v10 }
 0x247   : > { %v3494_v56 = vcombine.low %v3438_v58, %v3454_v13  ;;  %v3495_v41 = vcombine.high %v3438_v58, %v3454_v13  ;;  %v3510_v31 = vcombine.low %v3445_v60, %v3461_v38  ;;  %v3511_v59 = vcombine.high %v3445_v60, %v3461_v38  ;;  %v1902_v4 = vpop.f32.mrb[66].mxu1 }
 0x248   : > { %v3638_v61 = vrot.slane %v3630_v50, %v8738_v44  ;;  %v3645_v7 = vrot.slane %v3631_v49, %v8738_v44  ;;  %v3654_v48 = vrot.slane %v3646_v55, %v8738_v44  ;;  %v9039_v2 = vrot.slane %v3647_v45, %v8738_v44  ;;  %v1904_v63 = vpop.f32.mrb[67].mxu1 }
 0x249   : > { %v3502_v15 = vrot.slane %v3494_v56, %v8738_v44  ;;  %v3509_v16 = vrot.slane %v3495_v41, %v8738_v44  ;;  %v9044_v0 = vrot.slane %v3510_v31, %v8738_v44  ;;  %v9047_v47 = vrot.slane %v3511_v59, %v8738_v44 }
 0x24a   : > { %v3662_v58 = vcombine.low %v3606_v21, %v3638_v61  ;;  %v3663_v28 = vcombine.high %v3606_v21, %v3638_v61  ;;  %v3664_v10 = vcombine.low %v8991_v29, %v3645_v7  ;;  %v3665_v54 = vcombine.high %v8991_v29, %v3645_v7 }
 0x24b   : > { %v3526_v60 = vcombine.low %v8981_v51, %v3502_v15  ;;  %v3527_v13 = vcombine.high %v8981_v51, %v3502_v15  ;;  %v3528_v38 = vcombine.low %v8997_v14, %v3509_v16  ;;  %v3529_v50 = vcombine.high %v8997_v14, %v3509_v16  ;;  %v2050_v49 = vpop.f32.mrb[68].mxu1 }
 0x24c   : > { %4838 = vmatprep.subr.mxu1 %v3662_v58  ;;  %4915 = vmatprep.subr.mxu0 %v3663_v28  ;;  %v3666_v55 = vcombine.low %v9015_v11, %v3654_v48  ;;  %v3667_v45 = vcombine.high %v9015_v11, %v3654_v48  ;;  %v3530_v21 = vcombine.low %v9003_v25, %v9044_v0  ;;  %v2052_v56 = vpop.f32.mrb[69].mxu1 }
 0x24d   : > { %4839 = vmatpush1.msra.mxu1 %v3526_v60  ;;  %4916 = vmatpush1.msra.mxu0 %v3527_v13  ;;  %v3531_v51 = vcombine.high %v9003_v25, %v9044_v0  ;;  %v3668_v29 = vcombine.low %v9021_v1, %v9039_v2  ;;  %v3669_v14 = vcombine.high %v9021_v1, %v9039_v2 }
 0x24e   : > { %8098 = vmatmul.mubr.msk.f32.vlgmr.msra.gmra.mrb[112].mxu1 %vm591_vm1, %v8787_v53  ;;  %8100 = vmatmul.mubr.msk.f32.vlgmr.msra.gmra.mrb[112].mxu0 %vm591_vm1, %v8787_v53  ;;  %v3532_v11 = vcombine.low %v9009_v52, %v9047_v47  ;;  %v3533_v41 = vcombine.high %v9009_v52, %v9047_v47  ;;  %v3110_v31 = vadd.f32 %v1902_v4, %v1898_v35 }
 0x24f   : > { %4992 = vmatprep.subr.mxu1 %v3664_v10  ;;  %5069 = vmatprep.subr.mxu0 %v3665_v54  ;;  %v3078_v25 = vsub.f32 %v1896_v17, %v1904_v63  ;;  %v2056_v59 = vpop.f32.mrb[70].mxu1  ;;  %v4126_v1 = vcombine.low %v8976_v18, %v9028_v36  ;;  %v4127_v61 = vcombine.high %v8976_v18, %v9028_v36 }
 0x250   : > { %4993 = vmatpush1.msra.mxu1 %v3528_v38  ;;  %5070 = vmatpush1.msra.mxu0 %v3529_v50  ;;  %v3112_v7 = vadd.f32 %v2056_v59, %v2052_v56  ;;  %v2058_v48 = vpop.f32.mrb[71].mxu1  ;;  %v3990_v2 = vcombine.low %v8978_v19, %v9033_v42  ;;  %v3991_v35 = vcombine.high %v8978_v19, %v9033_v42 }
 0x251   : > { %5146 = vmatprep.subr.mxu1 %v3666_v55  ;;  %5223 = vmatprep.subr.mxu0 %v3667_v45  ;;  %v3080_v17 = vsub.f32 %v2050_v49, %v2058_v48  ;;  %v9091_v15 = vrot.slane %v3822_v23, %v8728_v9  ;;  %v9105_v54 = vrot.slane %v3823_v24, %v8728_v9 }
 0x252   : > { %4908 = vmatprep.mubr.f32.mxu1 %v8268_v5  ;;  %4985 = vmatprep.mubr.f32.mxu0 %v8268_v5  ;;  %v3806_v4 = vcombine.low %v3110_v31, %v3112_v7  ;;  %v3807_v63 = vcombine.high %v3110_v31, %v3112_v7  ;;  %v3694_v38 = vrot.slane %v3686_v26, %v8728_v9 }
 0x253   : > { %8099 = vmatmul.mubr.msk.f32.gmra.mrb[114].mxu1 %vm591_vm1, %v8820_v12  ;;  %8101 = vmatmul.mubr.msk.f32.gmra.mrb[114].mxu0 %vm591_vm1, %v8820_v12  ;;  %v3670_v16 = vcombine.low %v3078_v25, %v3080_v17  ;;  %v3671_v0 = vcombine.high %v3078_v25, %v3080_v17  ;;  %v2204_v58 = vpop.f32.mrb[72].mxu1  ;;  %v3701_v50 = vrot.slane %v3687_v27, %v8728_v9 }
 0x254   : > { %5056 = vmatprep.mubr.f32.mxu1 %v8268_v5  ;;  %5133 = vmatprep.mubr.f32.mxu0 %v8268_v5  ;;  %v9096_v28 = vrot.slane %v3806_v4, %v8728_v9  ;;  %v9099_v10 = vrot.slane %v3807_v63, %v8728_v9  ;;  %v2206_v23 = vpop.f32.mrb[73].mxu1 }
 0x255   : > { %v3678_v60 = vrot.slane %v3670_v16, %v8728_v9  ;;  %v3685_v13 = vrot.slane %v3671_v0, %v8728_v9 }
 0x256   : > { %v3870_v6 = vcombine.low %v9096_v28, %v9091_v15  ;;  %v3871_v20 = vcombine.high %v9096_v28, %v9091_v15  ;;  %v3886_v24 = vcombine.low %v9099_v10, %v9105_v54  ;;  %v3887_v49 = vcombine.high %v9099_v10, %v9105_v54 }
 0x257   : > { %8102 = vmatmul.mubr.msk.f32.vlgmr.msra.gmra.mrb[116].mxu1 %vm591_vm1, %v8787_v53  ;;  %8104 = vmatmul.mubr.msk.f32.vlgmr.msra.gmra.mrb[116].mxu0 %vm591_vm1, %v8787_v53  ;;  %v3734_v8 = vcombine.low %v3678_v60, %v3694_v38  ;;  %v3735_v22 = vcombine.high %v3678_v60, %v3694_v38  ;;  %v3750_v26 = vcombine.low %v3685_v13, %v3701_v50  ;;  %v2210_v27 = vpop.f32.mrb[74].mxu1 }
 0x258   : > { %5147 = vmatpush1.msra.mxu1 %v3530_v21  ;;  %5224 = vmatpush1.msra.mxu0 %v3531_v51  ;;  %v3751_v55 = vcombine.high %v3685_v13, %v3701_v50  ;;  %v3114_v45 = vadd.f32 %v2210_v27, %v2206_v23  ;;  %v2212_v56 = vpop.f32.mrb[75].mxu1  ;;  %v3878_v52 = vrot.slane %v3870_v6, %v8738_v44 }
 0x259   : > { %5300 = vmatprep.subr.mxu1 %v3668_v29  ;;  %5377 = vmatprep.subr.mxu0 %v3669_v14  ;;  %v3082_v31 = vsub.f32 %v2204_v58, %v2212_v56  ;;  %v3862_v29 = vrot.slane %v3854_v30, %v8728_v9  ;;  %v9149_v14 = vrot.slane %v3855_v32, %v8728_v9 }
 0x25a   : > { %5062 = vmatprep.mubr.f32.mxu1 %v8268_v5  ;;  %5139 = vmatprep.mubr.f32.mxu0 %v8268_v5  ;;  %v3726_v30 = vrot.slane %v3718_v33, %v8728_v9  ;;  %v9166_v62 = vrot.slane %v3734_v8, %v8738_v44  ;;  %v9172_v47 = vrot.slane %v3735_v22, %v8738_v44 }
 0x25b   : > { %8103 = vmatmul.mubr.msk.f32.gmra.mrb[118].mxu1 %vm591_vm1, %v8820_v12  ;;  %8105 = vmatmul.mubr.msk.f32.gmra.mrb[118].mxu0 %vm591_vm1, %v8820_v12  ;;  %v2358_v25 = vpop.f32.mrb[76].mxu1  ;;  %v9175_v33 = vrot.slane %v3750_v26, %v8738_v44  ;;  %v9178_v43 = vrot.slane %v3751_v55, %v8738_v44  ;;  %v9189_v15 = vrot.slane %v3871_v20, %v8738_v44 }
 0x25c   : > { %5210 = vmatprep.mubr.f32.mxu1 %v8268_v5  ;;  %5287 = vmatprep.mubr.f32.mxu0 %v8268_v5  ;;  %v2360_v21 = vpop.f32.mrb[77].mxu1  ;;  %v9194_v58 = vrot.slane %v3886_v24, %v8738_v44  ;;  %v9197_v28 = vrot.slane %v3887_v49, %v8738_v44 }
 0x25f   : > { %8106 = vmatmul.mubr.msk.f32.vlgmr.msra.gmra.mrb[120].mxu1 %vm591_vm1, %v8787_v53  ;;  %8108 = vmatmul.mubr.msk.f32.vlgmr.msra.gmra.mrb[120].mxu0 %vm591_vm1, %v8787_v53  ;;  %v2364_v51 = vpop.f32.mrb[78].mxu1 }
 0x260   : > { %5301 = vmatpush1.msra.mxu1 %v3532_v11  ;;  %5378 = vmatpush1.msra.mxu0 %v3533_v41  ;;  %v3116_v59 = vadd.f32 %v2364_v51, %v2360_v21  ;;  %v2366_v7 = vpop.f32.mrb[79].mxu1 }
 0x261   : > { %v3084_v32 = vsub.f32 %v2358_v25, %v2366_v7  ;;  %5216 = vmatprep.mubr.f32.mxu1 %v8268_v5  ;;  %5293 = vmatprep.mubr.f32.mxu0 %v8268_v5 }
 0x262   : > { %v3838_v11 = vcombine.low %v3114_v45, %v3116_v59  ;;  %v3839_v41 = vcombine.high %v3114_v45, %v3116_v59 }
 0x263   : > { %v3702_v3 = vcombine.low %v3082_v31, %v3084_v32  ;;  %v3703_v34 = vcombine.high %v3082_v31, %v3084_v32  ;;  %8107 = vmatmul.mubr.msk.f32.gmra.mrb[122].mxu1 %vm591_vm1, %v8820_v12  ;;  %8109 = vmatmul.mubr.msk.f32.gmra.mrb[122].mxu0 %vm591_vm1, %v8820_v12  ;;  %v2512_v48 = vpop.f32.mrb[80].mxu1 }
 0x264   : > { %v3846_v17 = vrot.slane %v3838_v11, %v8728_v9  ;;  %v3853_v4 = vrot.slane %v3839_v41, %v8728_v9  ;;  %5364 = vmatprep.mubr.f32.mxu1 %v8268_v5  ;;  %5441 = vmatprep.mubr.f32.mxu0 %v8268_v5  ;;  %v2514_v63 = vpop.f32.mrb[81].mxu1 }
 0x265   : > { %v3710_v16 = vrot.slane %v3702_v3, %v8728_v9  ;;  %v3717_v0 = vrot.slane %v3703_v34, %v8728_v9 }
 0x266   : > { %v3902_v10 = vcombine.low %v3846_v17, %v3862_v29  ;;  %v3903_v54 = vcombine.high %v3846_v17, %v3862_v29  ;;  %v3918_v23 = vcombine.low %v3853_v4, %v9149_v14  ;;  %v3919_v60 = vcombine.high %v3853_v4, %v9149_v14 }
 0x267   : > { %v3766_v13 = vcombine.low %v3710_v16, %v3726_v30  ;;  %v3767_v38 = vcombine.high %v3710_v16, %v3726_v30  ;;  %v3782_v50 = vcombine.low %v3717_v0, %v3733_v40  ;;  %v3783_v6 = vcombine.high %v3717_v0, %v3733_v40  ;;  %8110 = vmatmul.mubr.msk.f32.vlgmr.msra.gmra.mrb[124].mxu1 %vm591_vm1, %v8787_v53  ;;  %v2518_v20 = vpop.f32.mrb[82].mxu1 }
 0x268   : > { %8112 = vmatmul.mubr.msk.f32.vlgmr.msra.gmra.mrb[124].mxu0 %vm591_vm1, %v8787_v53  ;;  %5370 = vmatprep.mubr.f32.mxu1 %v8268_v5  ;;  %v3910_v24 = vrot.slane %v3902_v10, %v8738_v44  ;;  %v3118_v49 = vadd.f32 %v2518_v20, %v2514_v63  ;;  %v2520_v8 = vpop.f32.mrb[83].mxu1  ;;  %v3917_v22 = vrot.slane %v3903_v54, %v8738_v44 }
 0x269   : > { %v3774_v26 = vrot.slane %v3766_v13, %v8738_v44  ;;  %v3781_v27 = vrot.slane %v3767_v38, %v8738_v44  ;;  %v9211_v55 = vrot.slane %v3782_v50, %v8738_v44  ;;  %v9214_v45 = vrot.slane %v3783_v6, %v8738_v44  ;;  %5447 = vmatprep.mubr.f32.mxu0 %v8268_v5 }
 0x26a   : > { %v3934_v56 = vcombine.low %v3878_v52, %v3910_v24  ;;  %v3935_v31 = vcombine.high %v3878_v52, %v3910_v24  ;;  %v3086_v25 = vsub.f32 %v2512_v48, %v2520_v8  ;;  %v3936_v21 = vcombine.low %v9189_v15, %v3917_v22 }
 0x26b   : > { %8111 = vmatmul.mubr.msk.f32.gmra.mrb[126].mxu1 %vm591_vm1, %v8820_v12  ;;  %v3798_v51 = vcombine.low %v9166_v62, %v3774_v26  ;;  %v3799_v29 = vcombine.high %v9166_v62, %v3774_v26  ;;  %v3937_v14 = vcombine.high %v9189_v15, %v3917_v22  ;;  %v2666_v59 = vpop.f32.mrb[84].mxu1  ;;  %v3800_v7 = vcombine.low %v9172_v47, %v3781_v27 }
 0x26c   : > { %8113 = vmatmul.mubr.msk.f32.gmra.mrb[126].mxu0 %vm591_vm1, %v8820_v12  ;;  %5454 = vmatprep.subr.mxu1 %v3934_v56  ;;  %v3801_v30 = vcombine.high %v9172_v47, %v3781_v27  ;;  %v2668_v40 = vpop.f32.mrb[85].mxu1  ;;  %v3926_v32 = vrot.slane %v3918_v23, %v8738_v44  ;;  %v3802_v52 = vcombine.low %v9175_v33, %v9211_v55 }
 0x26d   : > { %5531 = vmatprep.subr.mxu0 %v3935_v31  ;;  %5455 = vmatpush1.msra.mxu1 %v3798_v51  ;;  %v3803_v62 = vcombine.high %v9175_v33, %v9211_v55  ;;  %v9233_v11 = vrot.slane %v3919_v60, %v8738_v44  ;;  %v3804_v41 = vcombine.low %v9178_v43, %v9214_v45 }
 0x26e   : > { %5518 = vmatprep.mubr.f32.mxu1 %v8268_v5  ;;  %5532 = vmatpush1.msra.mxu0 %v3799_v29  ;;  %v3938_v47 = vcombine.low %v9194_v58, %v3926_v32  ;;  %v3939_v3 = vcombine.high %v9194_v58, %v3926_v32  ;;  %v3805_v34 = vcombine.high %v9178_v43, %v9214_v45 }
 0x26f   : > { %5595 = vmatprep.mubr.f32.mxu0 %v8268_v5  ;;  %8114 = vmatmul.mubr.msk.f32.vlgmr.msra.gmra.mrb[128].mxu1 %vm591_vm1, %v8787_v53  ;;  %v2672_v33 = vpop.f32.mrb[86].mxu1  ;;  %v3940_v48 = vcombine.low %v9197_v28, %v9233_v11  ;;  %v3941_v17 = vcombine.high %v9197_v28, %v9233_v11  ;;  %v9785_v58 = vcombine.low %v8955_v37, %v8960_v46 }
 0x270   : > { %8116 = vmatmul.mubr.msk.f32.vlgmr.msra.gmra.mrb[128].mxu0 %vm591_vm1, %v8787_v53  ;;  %5524 = vmatprep.mubr.f32.mxu1 %v8268_v5  ;;  %v3120_v4 = vadd.f32 %v2672_v33, %v2668_v40  ;;  %v2674_v63 = vpop.f32.mrb[87].mxu1  ;;  %v9786_v10 = vcombine.high %v8955_v37, %v8960_v46  ;;  %v9787_v6 = vcombine.low %v8958_v39, %v8962_v57 }
 0x271   : > { %5601 = vmatprep.mubr.f32.mxu0 %v8268_v5  ;;  %5608 = vmatprep.subr.mxu1 %v3936_v21  ;;  %v3088_v15 = vsub.f32 %v2666_v59, %v2674_v63  ;;  %v9257_v28 = vrot.slane %v9785_v58, %v8728_v9  ;;  %v9318_v32 = vrot.slane %v4127_v61, %v8728_v9 }
 0x272   : > { %5685 = vmatprep.subr.mxu0 %v3937_v14  ;;  %5609 = vmatpush1.msra.mxu1 %v3800_v7  ;;  %v4078_v16 = vcombine.low %v3118_v49, %v3120_v4  ;;  %v4079_v0 = vcombine.high %v3118_v49, %v3120_v4  ;;  %v9265_v54 = vrot.slane %v9786_v10, %v8728_v9 }
 0x273   : > { %8115 = vmatmul.mubr.msk.f32.gmra.mrb[130].mxu1 %vm591_vm1, %v8820_v12  ;;  %5686 = vmatpush1.msra.mxu0 %v3801_v30  ;;  %v3942_v23 = vcombine.low %v3086_v25, %v3088_v15  ;;  %v3943_v60 = vcombine.high %v3086_v25, %v3088_v15  ;;  %v2820_v13 = vpop.f32.mrb[88].mxu1  ;;  %v3966_v37 = vrot.slane %v9787_v6, %v8728_v9 }
 0x274   : > { %8117 = vmatmul.mubr.msk.f32.gmra.mrb[130].mxu0 %vm591_vm1, %v8820_v12  ;;  %5672 = vmatprep.mubr.f32.mxu1 %v8268_v5  ;;  %v4086_v38 = vrot.slane %v4078_v16, %v8728_v9  ;;  %v9272_v50 = vrot.slane %v4079_v0, %v8728_v9  ;;  %v2822_v46 = vpop.f32.mrb[89].mxu1  ;;  %v9788_v49 = vcombine.high %v8958_v39, %v8962_v57 }
 0x275   : > { %5749 = vmatprep.mubr.f32.mxu0 %v8268_v5  ;;  %v3950_v20 = vrot.slane %v3942_v23, %v8728_v9  ;;  %v3957_v24 = vrot.slane %v3943_v60, %v8728_v9  ;;  %5762 = vmatprep.subr.mxu1 %v3938_v47  ;;  %v4134_v30 = vrot.slane %v4126_v1, %v8728_v9 }
 0x276   : > { %v3973_v8 = vrot.slane %v9788_v49, %v8728_v9  ;;  %v4142_v22 = vcombine.low %v4086_v38, %v9257_v28  ;;  %v4143_v26 = vcombine.high %v4086_v38, %v9257_v28  ;;  %v4158_v27 = vcombine.low %v9272_v50, %v9265_v54  ;;  %5839 = vmatprep.subr.mxu0 %v3939_v3 }
 0x277   : > { %v4159_v55 = vcombine.high %v9272_v50, %v9265_v54  ;;  %8118 = vmatmul.mubr.msk.f32.vlgmr.msra.gmra.mrb[132].mxu1 %vm591_vm1, %v8787_v53  ;;  %v4006_v56 = vcombine.low %v3950_v20, %v3966_v37  ;;  %v4007_v31 = vcombine.high %v3950_v20, %v3966_v37  ;;  %v2826_v57 = vpop.f32.mrb[90].mxu1  ;;  %v3998_v1 = vrot.slane %v3990_v2, %v8728_v9 }
 0x278   : > { %v4022_v25 = vcombine.low %v3957_v24, %v3973_v8  ;;  %v4023_v39 = vcombine.high %v3957_v24, %v3973_v8  ;;  %8120 = vmatmul.mubr.msk.f32.vlgmr.msra.gmra.mrb[132].mxu0 %vm591_vm1, %v8787_v53  ;;  %5678 = vmatprep.mubr.f32.mxu1 %v8268_v5  ;;  %v3122_v21 = vadd.f32 %v2826_v57, %v2822_v46  ;;  %v2828_v51 = vpop.f32.mrb[91].mxu1 }
 0x279   : > { %5755 = vmatprep.mubr.f32.mxu0 %v8268_v5  ;;  %v3090_v29 = vsub.f32 %v2820_v13, %v2828_v51  ;;  %5763 = vmatpush1.msra.mxu1 %v3802_v52  ;;  %v4005_v11 = vrot.slane %v3991_v35, %v8728_v9  ;;  %v4150_v18 = vrot.slane %v4142_v22, %v8738_v44  ;;  %v8203_v51 = vld [vmem:[%s9781_s3 + $0x8] sm:$0xff] }
 0x27a   : > { %5840 = vmatpush1.msra.mxu0 %v3803_v62  ;;  %5916 = vmatprep.subr.mxu1 %v3940_v48  ;;  %v4014_v36 = vrot.slane %v4006_v56, %v8738_v44  ;;  %v9336_v2 = vrot.slane %v4143_v26, %v8738_v44  ;;  %v9339_v43 = vrot.slane %v4007_v31, %v8738_v44 }
 0x27b   : > { %8119 = vmatmul.mubr.msk.f32.gmra.mrb[134].mxu1 %vm591_vm1, %v8820_v12  ;;  %v2974_v14 = vpop.f32.mrb[92].mxu1  ;;  %5993 = vmatprep.subr.mxu0 %v3941_v17  ;;  %v9342_v45 = vrot.slane %v4022_v25, %v8738_v44  ;;  %v9347_v35 = vrot.slane %v4023_v39, %v8738_v44  ;;  %v4166_v48 = vrot.slane %v4158_v27, %v8738_v44 }
 0x27c   : > { %8121 = vmatmul.mubr.msk.f32.gmra.mrb[134].mxu0 %vm591_vm1, %v8820_v12  ;;  %5826 = vmatprep.mubr.f32.mxu1 %v8268_v5  ;;  %v2976_v59 = vpop.f32.mrb[93].mxu1  ;;  %v9359_v17 = vrot.slane %v4159_v55, %v8738_v44 }
 0x27d   : > { %5903 = vmatprep.mubr.f32.mxu0 %v8268_v5 }
 0x27f   : > { %8122 = vmatmul.mubr.msk.f32.vlgmr.msra.gmra.mrb[136].mxu1 %vm591_vm1, %v8787_v53  ;;  %v2980_v7 = vpop.f32.mrb[94].mxu1 }
 0x280   : > { %8124 = vmatmul.mubr.msk.f32.vlgmr.msra.gmra.mrb[136].mxu0 %vm591_vm1, %v8787_v53  ;;  %5917 = vmatpush1.msra.mxu1 %v3804_v41  ;;  %v3124_v40 = vadd.f32 %v2980_v7, %v2976_v59  ;;  %v2982_v52 = vpop.f32.mrb[95].mxu1 }
 0x281   : > { %5994 = vmatpush1.msra.mxu0 %v3805_v34  ;;  %v3092_v62 = vsub.f32 %v2974_v14, %v2982_v52  ;;  %5832 = vmatprep.mubr.f32.mxu1 %v8268_v5 }
 0x282   : > { %v4110_v61 = vcombine.low %v3122_v21, %v3124_v40  ;;  %v4111_v41 = vcombine.high %v3122_v21, %v3124_v40  ;;  %5909 = vmatprep.mubr.f32.mxu0 %v8268_v5 }
 0x283   : > { %v3974_v19 = vcombine.low %v3090_v29, %v3092_v62  ;;  %v3975_v42 = vcombine.high %v3090_v29, %v3092_v62  ;;  %8123 = vmatmul.mubr.msk.f32.gmra.mrb[138].mxu1 %vm591_vm1, %v8820_v12 }
 0x284   : > { %v4118_v47 = vrot.slane %v4110_v61, %v8728_v9  ;;  %v4125_v3 = vrot.slane %v4111_v41, %v8728_v9  ;;  %8125 = vmatmul.mubr.msk.f32.gmra.mrb[138].mxu0 %vm591_vm1, %v8820_v12  ;;  %5980 = vmatprep.mubr.f32.mxu1 %v8268_v5 }
 0x285   : > { %v3982_v34 = vrot.slane %v3974_v19, %v8728_v9  ;;  %v3989_v33 = vrot.slane %v3975_v42, %v8728_v9  ;;  %6057 = vmatprep.mubr.f32.mxu0 %v8268_v5 }
 0x286   : > { %v4174_v4 = vcombine.low %v4118_v47, %v4134_v30  ;;  %v4175_v63 = vcombine.high %v4118_v47, %v4134_v30  ;;  %v4190_v15 = vcombine.low %v4125_v3, %v9318_v32  ;;  %v4191_v16 = vcombine.high %v4125_v3, %v9318_v32 }
 0x287   : > { %v4038_v0 = vcombine.low %v3982_v34, %v3998_v1  ;;  %v4039_v58 = vcombine.high %v3982_v34, %v3998_v1  ;;  %v4054_v28 = vcombine.low %v3989_v33, %v4005_v11  ;;  %v4055_v10 = vcombine.high %v3989_v33, %v4005_v11  ;;  %8126 = vmatmul.mubr.msk.f32.vlgmr.msra.gmra.mrb[140].mxu1 %vm591_vm1, %v8787_v53 }
 0x288   : > { %8128 = vmatmul.mubr.msk.f32.vlgmr.msra.gmra.mrb[140].mxu0 %vm591_vm1, %v8787_v53  ;;  %5986 = vmatprep.mubr.f32.mxu1 %v8268_v5  ;;  %v4182_v54 = vrot.slane %v4174_v4, %v8738_v44  ;;  %v4189_v23 = vrot.slane %v4175_v63, %v8738_v44  ;;  %v4198_v60 = vrot.slane %v4190_v15, %v8738_v44 }
 0x289   : > { %v4046_v13 = vrot.slane %v4038_v0, %v8738_v44  ;;  %v4053_v38 = vrot.slane %v4039_v58, %v8738_v44  ;;  %v4062_v50 = vrot.slane %v4054_v28, %v8738_v44  ;;  %v4069_v6 = vrot.slane %v4055_v10, %v8738_v44  ;;  %6063 = vmatprep.mubr.f32.mxu0 %v8268_v5 }
 0x28a   : > { %v4206_v37 = vcombine.low %v4150_v18, %v4182_v54  ;;  %v4207_v53 = vcombine.high %v4150_v18, %v4182_v54  ;;  %v4208_v46 = vcombine.low %v9336_v2, %v4189_v23  ;;  %v4209_v20 = vcombine.high %v9336_v2, %v4189_v23 }
 0x28b   : > { %8127 = vmatmul.mubr.msk.f32.gmra.mrb[142].mxu1 %vm591_vm1, %v8820_v12  ;;  %v4070_v24 = vcombine.low %v4014_v36, %v4046_v13  ;;  %v4071_v49 = vcombine.high %v4014_v36, %v4046_v13  ;;  %v4072_v8 = vcombine.low %v9339_v43, %v4053_v38  ;;  %v4073_v22 = vcombine.high %v9339_v43, %v4053_v38 }
 0x28c   : > { %8129 = vmatmul.mubr.msk.f32.gmra.mrb[142].mxu0 %vm591_vm1, %v8820_v12  ;;  %6070 = vmatprep.subr.mxu1 %v4206_v37  ;;  %v4210_v26 = vcombine.low %v4166_v48, %v4198_v60  ;;  %v4211_v27 = vcombine.high %v4166_v48, %v4198_v60  ;;  %v4074_v55 = vcombine.low %v9342_v45, %v4062_v50  ;;  %v8202_v12 = vld [vmem:[%s9781_s3] sm:$0xff] }
 0x28d   : > { %6147 = vmatprep.subr.mxu0 %v4207_v53  ;;  %6071 = vmatpush1.msra.mxu1 %v4070_v24  ;;  %v4075_v56 = vcombine.high %v9342_v45, %v4062_v50  ;;  %v4205_v31 = vrot.slane %v4191_v16, %v8738_v44  ;;  %v4076_v25 = vcombine.low %v9347_v35, %v4069_v6 }
 0x28e   : > { %6134 = vmatprep.mubr.f32.mxu1 %v8268_v5  ;;  %6148 = vmatpush1.msra.mxu0 %v4071_v49  ;;  %v4077_v39 = vcombine.high %v9347_v35, %v4069_v6 }
 0x28f   : > { %6211 = vmatprep.mubr.f32.mxu0 %v8268_v5  ;;  %8130 = vmatmul.mubr.msk.f32.vlgmr.msra.gmra.mrb[144].mxu1 %vm591_vm1, %v8202_v12  ;;  %v4212_v57 = vcombine.low %v9359_v17, %v4205_v31  ;;  %v4213_v21 = vcombine.high %v9359_v17, %v4205_v31 }
 0x290   : > { %8132 = vmatmul.mubr.msk.f32.vlgmr.msra.gmra.mrb[144].mxu0 %vm591_vm1, %v8202_v12  ;;  %6140 = vmatprep.mubr.f32.mxu1 %v8268_v5 }
 0x291   : > { %6217 = vmatprep.mubr.f32.mxu0 %v8268_v5  ;;  %6224 = vmatprep.subr.mxu1 %v4208_v46 }
 0x292   : > { %6301 = vmatprep.subr.mxu0 %v4209_v20  ;;  %6225 = vmatpush1.msra.mxu1 %v4072_v8 }
 0x293   : > { %8131 = vmatmul.mubr.msk.f32.gmra.mrb[146].mxu1 %vm591_vm1, %v8203_v51  ;;  %6302 = vmatpush1.msra.mxu0 %v4073_v22 }
 0x294   : > { %8133 = vmatmul.mubr.msk.f32.gmra.mrb[146].mxu0 %vm591_vm1, %v8203_v51  ;;  %6288 = vmatprep.mubr.f32.mxu1 %v8268_v5 }
 0x295   : > { %6365 = vmatprep.mubr.f32.mxu0 %v8268_v5  ;;  %6378 = vmatprep.subr.mxu1 %v4210_v26 }
 0x296   : > { %6455 = vmatprep.subr.mxu0 %v4211_v27 }
 0x297   : > { %8134 = vmatmul.mubr.msk.f32.vlgmr.msra.gmra.mrb[148].mxu1 %vm591_vm1, %v8202_v12 }
 0x298   : > { %8136 = vmatmul.mubr.msk.f32.vlgmr.msra.gmra.mrb[148].mxu0 %vm591_vm1, %v8202_v12  ;;  %6294 = vmatprep.mubr.f32.mxu1 %v8268_v5 }
 0x299   : > { %6371 = vmatprep.mubr.f32.mxu0 %v8268_v5  ;;  %6379 = vmatpush1.msra.mxu1 %v4074_v55 }
 0x29a   : > { %6456 = vmatpush1.msra.mxu0 %v4075_v56  ;;  %6532 = vmatprep.subr.mxu1 %v4212_v57 }
 0x29b   : > { %8135 = vmatmul.mubr.msk.f32.gmra.mrb[150].mxu1 %vm591_vm1, %v8203_v51  ;;  %6609 = vmatprep.subr.mxu0 %v4213_v21 }
 0x29c   : > { %8137 = vmatmul.mubr.msk.f32.gmra.mrb[150].mxu0 %vm591_vm1, %v8203_v51  ;;  %6442 = vmatprep.mubr.f32.mxu1 %v8268_v5 }
 0x29d   : > { %6519 = vmatprep.mubr.f32.mxu0 %v8268_v5 }
 0x29f   : > { %8138 = vmatmul.mubr.msk.f32.vlgmr.msra.gmra.mrb[152].mxu1 %vm591_vm1, %v8202_v12 }
 0x2a0   : > { %8140 = vmatmul.mubr.msk.f32.vlgmr.msra.gmra.mrb[152].mxu0 %vm591_vm1, %v8202_v12  ;;  %6533 = vmatpush1.msra.mxu1 %v4076_v25 }
 0x2a1   : > { %6610 = vmatpush1.msra.mxu0 %v4077_v39  ;;  %6448 = vmatprep.mubr.f32.mxu1 %v8268_v5 }
 0x2a2   : > { %6525 = vmatprep.mubr.f32.mxu0 %v8268_v5 }
 0x2a3   : > { %8139 = vmatmul.mubr.msk.f32.gmra.mrb[154].mxu1 %vm591_vm1, %v8203_v51 }
 0x2a4   : > { %8141 = vmatmul.mubr.msk.f32.gmra.mrb[154].mxu0 %vm591_vm1, %v8203_v51  ;;  %6596 = vmatprep.mubr.f32.mxu1 %v8268_v5 }
 0x2a5   : > { %6673 = vmatprep.mubr.f32.mxu0 %v8268_v5 }
 0x2a7   : > { %8142 = vmatmul.mubr.msk.f32.vlgmr.msra.gmra.mrb[156].mxu1 %vm591_vm1, %v8202_v12 }
 0x2a8   : > { %8144 = vmatmul.mubr.msk.f32.vlgmr.msra.gmra.mrb[156].mxu0 %vm591_vm1, %v8202_v12  ;;  %6602 = vmatprep.mubr.f32.mxu1 %v8268_v5 }
 0x2a9   : > { %6679 = vmatprep.mubr.f32.mxu0 %v8268_v5 }
 0x2ab   : > { %8143 = vmatmul.mubr.msk.f32.gmra.mrb[158].mxu1 %vm591_vm1, %v8203_v51 }
 0x2ac   : > { %8145 = vmatmul.mubr.msk.f32.gmra.mrb[158].mxu0 %vm591_vm1, %v8203_v51 }
 0x2e1   : > { %v4288_v29 = vpop.f32.mrb[96].mxu1  ;;  %v4365_v14 = vpop.f32.mrb[96].mxu0 }
 0x2e2   : > { %v4290_v59 = vpop.f32.mrb[97].mxu1  ;;  %v4367_v7 = vpop.f32.mrb[97].mxu0 }
 0x2e6   : > { %v4294_v30 = vpop.f32.mrb[98].mxu1  ;;  %v4371_v40 = vpop.f32.mrb[98].mxu0 }
 0x2e7   : > { %v6718_v32 = vadd.f32 %v4294_v30, %v4290_v59  ;;  %v6719_v52 = vadd.f32 %v4371_v40, %v4367_v7  ;;  %v4296_v1 = vpop.f32.mrb[99].mxu1  ;;  %v4373_v62 = vpop.f32.mrb[99].mxu0 }
 0x2e8   : > { %v6686_v11 = vsub.f32 %v4288_v29, %v4296_v1  ;;  %v6687_v18 = vsub.f32 %v4365_v14, %v4373_v62 }
 0x2ea   : > { %v4442_v36 = vpop.f32.mrb[100].mxu1  ;;  %v4519_v61 = vpop.f32.mrb[100].mxu0 }
 0x2eb   : > { %v4444_v41 = vpop.f32.mrb[101].mxu1  ;;  %v4521_v5 = vpop.f32.mrb[101].mxu0 }
 0x2ee   : > { %v4448_v2 = vpop.f32.mrb[102].mxu1  ;;  %v4525_v43 = vpop.f32.mrb[102].mxu0 }
 0x2ef   : > { %v6720_v45 = vadd.f32 %v4448_v2, %v4444_v41  ;;  %v6721_v19 = vadd.f32 %v4525_v43, %v4521_v5  ;;  %v4450_v42 = vpop.f32.mrb[103].mxu1  ;;  %v4527_v35 = vpop.f32.mrb[103].mxu0 }
 0x2f0   : > { %v6688_v47 = vsub.f32 %v4442_v36, %v4450_v42  ;;  %v6689_v3 = vsub.f32 %v4519_v61, %v4527_v35 }
 0x2f1   : > { %v6886_v34 = vcombine.low %v6718_v32, %v6720_v45  ;;  %v6887_v33 = vcombine.high %v6718_v32, %v6720_v45  ;;  %v6902_v48 = vcombine.low %v6719_v52, %v6721_v19  ;;  %v6903_v17 = vcombine.high %v6719_v52, %v6721_v19 }
 0x2f2   : > { %v6750_v4 = vcombine.low %v6686_v11, %v6688_v47  ;;  %v6751_v63 = vcombine.high %v6686_v11, %v6688_v47  ;;  %v6766_v15 = vcombine.low %v6687_v18, %v6689_v3  ;;  %v6767_v16 = vcombine.high %v6687_v18, %v6689_v3  ;;  %v4596_v0 = vpop.f32.mrb[104].mxu1  ;;  %v4673_v58 = vpop.f32.mrb[104].mxu0 }
 0x2f3   : > { %v6894_v28 = vrot.slane %v6886_v34, %v8728_v9  ;;  %v6901_v10 = vrot.slane %v6887_v33, %v8728_v9  ;;  %v6910_v54 = vrot.slane %v6902_v48, %v8728_v9  ;;  %v6917_v23 = vrot.slane %v6903_v17, %v8728_v9  ;;  %v4598_v60 = vpop.f32.mrb[105].mxu1  ;;  %v4675_v13 = vpop.f32.mrb[105].mxu0 }
 0x2f4   : > { %v6758_v38 = vrot.slane %v6750_v4, %v8728_v9  ;;  %v6765_v50 = vrot.slane %v6751_v63, %v8728_v9  ;;  %v6774_v6 = vrot.slane %v6766_v15, %v8728_v9  ;;  %v6781_v37 = vrot.slane %v6767_v16, %v8728_v9 }
 0x2f5   : > { %v6950_v53 = vcombine.low %v6894_v28, %v6910_v54  ;;  %v6951_v46 = vcombine.high %v6894_v28, %v6910_v54  ;;  %v6966_v20 = vcombine.low %v6901_v10, %v6917_v23  ;;  %v6967_v24 = vcombine.high %v6901_v10, %v6917_v23 }
 0x2f6   : > { %v6814_v49 = vcombine.low %v6758_v38, %v6774_v6  ;;  %v6815_v8 = vcombine.high %v6758_v38, %v6774_v6  ;;  %v6830_v22 = vcombine.low %v6765_v50, %v6781_v37  ;;  %v6831_v26 = vcombine.high %v6765_v50, %v6781_v37  ;;  %v4602_v27 = vpop.f32.mrb[106].mxu1  ;;  %v4679_v55 = vpop.f32.mrb[106].mxu0 }
 0x2f7   : > { %v4604_v56 = vpop.f32.mrb[107].mxu1  ;;  %v4681_v31 = vpop.f32.mrb[107].mxu0  ;;  %v6722_v25 = vadd.f32 %v4602_v27, %v4598_v60  ;;  %v6723_v39 = vadd.f32 %v4679_v55, %v4675_v13  ;;  %v6958_v7 = vrot.slane %v6950_v53, %v8738_v44  ;;  %v6965_v30 = vrot.slane %v6951_v46, %v8738_v44 }
 0x2f8   : > { %v6690_v12 = vsub.f32 %v4596_v0, %v4604_v56  ;;  %v6691_v57 = vsub.f32 %v4673_v58, %v4681_v31  ;;  %v9440_v40 = vrot.slane %v6966_v20, %v8738_v44  ;;  %v9443_v62 = vrot.slane %v6967_v24, %v8738_v44 }
 0x2f9   : > { %v9446_v11 = vrot.slane %v6814_v49, %v8738_v44  ;;  %v9449_v41 = vrot.slane %v6815_v8, %v8738_v44  ;;  %v6838_v15 = vrot.slane %v6830_v22, %v8738_v44  ;;  %v6845_v16 = vrot.slane %v6831_v26, %v8738_v44 }
 0x2fa   : > { %v4750_v21 = vpop.f32.mrb[108].mxu1 }
 0x2fb   : > { %v4827_v51 = vpop.f32.mrb[108].mxu0  ;;  %v4752_v29 = vpop.f32.mrb[109].mxu1 }
 0x2fc   : > { %v4829_v14 = vpop.f32.mrb[109].mxu0 }
 0x2fe   : > { %v4756_v59 = vpop.f32.mrb[110].mxu1 }
 0x2ff   : > { %v6724_v32 = vadd.f32 %v4756_v59, %v4752_v29  ;;  %v4833_v52 = vpop.f32.mrb[110].mxu0  ;;  %v4758_v1 = vpop.f32.mrb[111].mxu1 }
 0x300   : > { %v6725_v18 = vadd.f32 %v4833_v52, %v4829_v14  ;;  %v6692_v36 = vsub.f32 %v4750_v21, %v4758_v1  ;;  %v4835_v61 = vpop.f32.mrb[111].mxu0 }
 0x301   : > { %v6918_v5 = vcombine.low %v6722_v25, %v6724_v32  ;;  %v6919_v2 = vcombine.high %v6722_v25, %v6724_v32  ;;  %v6693_v43 = vsub.f32 %v4827_v51, %v4835_v61 }
 0x302   : > { %v6934_v45 = vcombine.low %v6723_v39, %v6725_v18  ;;  %v6935_v19 = vcombine.high %v6723_v39, %v6725_v18  ;;  %v6782_v42 = vcombine.low %v6690_v12, %v6692_v36  ;;  %v6783_v35 = vcombine.high %v6690_v12, %v6692_v36 }
 0x303   : > { %v6926_v47 = vrot.slane %v6918_v5, %v8728_v9  ;;  %v6933_v3 = vrot.slane %v6919_v2, %v8728_v9  ;;  %v6798_v34 = vcombine.low %v6691_v57, %v6693_v43  ;;  %v6799_v33 = vcombine.high %v6691_v57, %v6693_v43 }
 0x304   : > { %v6942_v48 = vrot.slane %v6934_v45, %v8728_v9  ;;  %v6949_v17 = vrot.slane %v6935_v19, %v8728_v9  ;;  %v6790_v4 = vrot.slane %v6782_v42, %v8728_v9  ;;  %v6797_v63 = vrot.slane %v6783_v35, %v8728_v9 }
 0x305   : > { %v6806_v0 = vrot.slane %v6798_v34, %v8728_v9  ;;  %v6813_v58 = vrot.slane %v6799_v33, %v8728_v9 }
 0x306   : > { %v6982_v28 = vcombine.low %v6926_v47, %v6942_v48  ;;  %v6983_v10 = vcombine.high %v6926_v47, %v6942_v48  ;;  %v6998_v54 = vcombine.low %v6933_v3, %v6949_v17  ;;  %v6999_v23 = vcombine.high %v6933_v3, %v6949_v17 }
 0x307   : > { %v6846_v60 = vcombine.low %v6790_v4, %v6806_v0  ;;  %v6847_v13 = vcombine.high %v6790_v4, %v6806_v0  ;;  %v6862_v38 = vcombine.low %v6797_v63, %v6813_v58  ;;  %v6863_v50 = vcombine.high %v6797_v63, %v6813_v58 }
 0x308   : > { %v6990_v6 = vrot.slane %v6982_v28, %v8738_v44  ;;  %v6997_v37 = vrot.slane %v6983_v10, %v8738_v44  ;;  %v7006_v53 = vrot.slane %v6998_v54, %v8738_v44  ;;  %v7013_v46 = vrot.slane %v6999_v23, %v8738_v44 }
 0x309   : > { %v6854_v20 = vrot.slane %v6846_v60, %v8738_v44  ;;  %v6861_v24 = vrot.slane %v6847_v13, %v8738_v44  ;;  %v6870_v49 = vrot.slane %v6862_v38, %v8738_v44  ;;  %v6877_v8 = vrot.slane %v6863_v50, %v8738_v44 }
 0x30a   : > { %v7014_v22 = vcombine.low %v6958_v7, %v6990_v6  ;;  %v7015_v26 = vcombine.high %v6958_v7, %v6990_v6  ;;  %v7016_v27 = vcombine.low %v6965_v30, %v6997_v37  ;;  %v7017_v55 = vcombine.high %v6965_v30, %v6997_v37 }
 0x30b   : > { %v7018_v56 = vcombine.low %v9440_v40, %v7006_v53  ;;  %v7019_v31 = vcombine.high %v9440_v40, %v7006_v53  ;;  %v7020_v25 = vcombine.low %v9443_v62, %v7013_v46  ;;  %v7021_v39 = vcombine.high %v9443_v62, %v7013_v46 }
 0x30c   : > { %7839 = vst [vmem:[%s9476_s11 + $0x8] sm:$0xff] %v7014_v22  ;;  %7841 = vst [vmem:[%s9476_s11 + $0x18] sm:$0xff] %v7015_v26  ;;  %v6878_v12 = vcombine.low %v9446_v11, %v6854_v20  ;;  %v6879_v57 = vcombine.high %v9446_v11, %v6854_v20  ;;  %v6880_v21 = vcombine.low %v9449_v41, %v6861_v24 }
 0x30d   : > { %7843 = vst [vmem:[%s9476_s11 + $0x28] sm:$0xff] %v7016_v27  ;;  %7845 = vst [vmem:[%s9476_s11 + $0x38] sm:$0xff] %v7017_v55  ;;  %v6881_v51 = vcombine.high %v9449_v41, %v6861_v24  ;;  %v6882_v29 = vcombine.low %v6838_v15, %v6870_v49  ;;  %v6883_v14 = vcombine.high %v6838_v15, %v6870_v49 }
 0x30e   : > { %7847 = vst [vmem:[%s9476_s11 + $0x48] sm:$0xff] %v7018_v56  ;;  %7849 = vst [vmem:[%s9476_s11 + $0x58] sm:$0xff] %v7019_v31  ;;  %v6884_v59 = vcombine.low %v6845_v16, %v6877_v8  ;;  %v6885_v7 = vcombine.high %v6845_v16, %v6877_v8 }
 0x30f   : > { %7851 = vst [vmem:[%s9476_s11 + $0x68] sm:$0xff] %v7020_v25  ;;  %7853 = vst [vmem:[%s9476_s11 + $0x78] sm:$0xff] %v7021_v39 }
 0x310   : > { %7838 = vst [vmem:[%s9476_s11] sm:$0xff] %v6878_v12  ;;  %7840 = vst [vmem:[%s9476_s11 + $0x10] sm:$0xff] %v6879_v57 }
 0x311   : > { %7842 = vst [vmem:[%s9476_s11 + $0x20] sm:$0xff] %v6880_v21  ;;  %7844 = vst [vmem:[%s9476_s11 + $0x30] sm:$0xff] %v6881_v51 }
 0x312   : > { %7846 = vst [vmem:[%s9476_s11 + $0x40] sm:$0xff] %v6882_v29  ;;  %7848 = vst [vmem:[%s9476_s11 + $0x50] sm:$0xff] %v6883_v14 }
 0x313   : > { %7850 = vst [vmem:[%s9476_s11 + $0x60] sm:$0xff] %v6884_v59  ;;  %7852 = vst [vmem:[%s9476_s11 + $0x70] sm:$0xff] %v6885_v7 }
 0x321   : > { %v4904_v30 = vpop.f32.mrb[112].mxu1  ;;  %v4981_v40 = vpop.f32.mrb[112].mxu0 }
 0x322   : > { %v4906_v32 = vpop.f32.mrb[113].mxu1  ;;  %v4983_v52 = vpop.f32.mrb[113].mxu0 }
 0x326   : > { %v4910_v1 = vpop.f32.mrb[114].mxu1  ;;  %v4987_v62 = vpop.f32.mrb[114].mxu0 }
 0x327   : > { %v6726_v11 = vadd.f32 %v4910_v1, %v4906_v32  ;;  %v6727_v18 = vadd.f32 %v4987_v62, %v4983_v52  ;;  %v4912_v36 = vpop.f32.mrb[115].mxu1  ;;  %v4989_v61 = vpop.f32.mrb[115].mxu0 }
 0x328   : > { %v6694_v41 = vsub.f32 %v4904_v30, %v4912_v36  ;;  %v6695_v5 = vsub.f32 %v4981_v40, %v4989_v61 }
 0x32a   : > { %v5058_v2 = vpop.f32.mrb[116].mxu1  ;;  %v5135_v43 = vpop.f32.mrb[116].mxu0 }
 0x32b   : > { %v5060_v45 = vpop.f32.mrb[117].mxu1  ;;  %v5137_v19 = vpop.f32.mrb[117].mxu0 }
 0x32e   : > { %v5064_v42 = vpop.f32.mrb[118].mxu1  ;;  %v5141_v35 = vpop.f32.mrb[118].mxu0 }
 0x32f   : > { %v6728_v47 = vadd.f32 %v5064_v42, %v5060_v45  ;;  %v6729_v3 = vadd.f32 %v5141_v35, %v5137_v19  ;;  %v5066_v34 = vpop.f32.mrb[119].mxu1  ;;  %v5143_v33 = vpop.f32.mrb[119].mxu0 }
 0x330   : > { %v6696_v48 = vsub.f32 %v5058_v2, %v5066_v34  ;;  %v6697_v17 = vsub.f32 %v5135_v43, %v5143_v33 }
 0x331   : > { %v7158_v4 = vcombine.low %v6726_v11, %v6728_v47  ;;  %v7159_v63 = vcombine.high %v6726_v11, %v6728_v47  ;;  %v7174_v15 = vcombine.low %v6727_v18, %v6729_v3  ;;  %v7175_v16 = vcombine.high %v6727_v18, %v6729_v3 }
 0x332   : > { %v7022_v0 = vcombine.low %v6694_v41, %v6696_v48  ;;  %v7023_v58 = vcombine.high %v6694_v41, %v6696_v48  ;;  %v7038_v28 = vcombine.low %v6695_v5, %v6697_v17  ;;  %v7039_v10 = vcombine.high %v6695_v5, %v6697_v17  ;;  %v5212_v54 = vpop.f32.mrb[120].mxu1  ;;  %v5289_v23 = vpop.f32.mrb[120].mxu0 }
 0x333   : > { %v7166_v60 = vrot.slane %v7158_v4, %v8728_v9  ;;  %v7173_v13 = vrot.slane %v7159_v63, %v8728_v9  ;;  %v7182_v38 = vrot.slane %v7174_v15, %v8728_v9  ;;  %v7189_v50 = vrot.slane %v7175_v16, %v8728_v9  ;;  %v5214_v6 = vpop.f32.mrb[121].mxu1  ;;  %v5291_v37 = vpop.f32.mrb[121].mxu0 }
 0x334   : > { %v7030_v53 = vrot.slane %v7022_v0, %v8728_v9  ;;  %v7037_v46 = vrot.slane %v7023_v58, %v8728_v9  ;;  %v7046_v20 = vrot.slane %v7038_v28, %v8728_v9  ;;  %v7053_v24 = vrot.slane %v7039_v10, %v8728_v9 }
 0x335   : > { %v7222_v49 = vcombine.low %v7166_v60, %v7182_v38  ;;  %v7223_v8 = vcombine.high %v7166_v60, %v7182_v38  ;;  %v7238_v22 = vcombine.low %v7173_v13, %v7189_v50  ;;  %v7239_v26 = vcombine.high %v7173_v13, %v7189_v50 }
 0x336   : > { %v7086_v27 = vcombine.low %v7030_v53, %v7046_v20  ;;  %v7087_v55 = vcombine.high %v7030_v53, %v7046_v20  ;;  %v7102_v56 = vcombine.low %v7037_v46, %v7053_v24  ;;  %v7103_v31 = vcombine.high %v7037_v46, %v7053_v24  ;;  %v5218_v25 = vpop.f32.mrb[122].mxu1  ;;  %v5295_v39 = vpop.f32.mrb[122].mxu0 }
 0x337   : > { %v5220_v12 = vpop.f32.mrb[123].mxu1  ;;  %v5297_v57 = vpop.f32.mrb[123].mxu0  ;;  %v6730_v21 = vadd.f32 %v5218_v25, %v5214_v6  ;;  %v6731_v51 = vadd.f32 %v5295_v39, %v5291_v37  ;;  %v9507_v52 = vrot.slane %v7222_v49, %v8738_v44  ;;  %v9510_v1 = vrot.slane %v7223_v8, %v8738_v44 }
 0x338   : > { %v6698_v29 = vsub.f32 %v5212_v54, %v5220_v12  ;;  %v6699_v14 = vsub.f32 %v5289_v23, %v5297_v57  ;;  %v9513_v62 = vrot.slane %v7238_v22, %v8738_v44  ;;  %v9516_v61 = vrot.slane %v7239_v26, %v8738_v44 }
 0x339   : > { %v9519_v41 = vrot.slane %v7086_v27, %v8738_v44  ;;  %v9522_v45 = vrot.slane %v7087_v55, %v8738_v44  ;;  %v7110_v60 = vrot.slane %v7102_v56, %v8738_v44  ;;  %v9536_v13 = vrot.slane %v7103_v31, %v8738_v44 }
 0x33a   : > { %v5366_v59 = vpop.f32.mrb[124].mxu1 }
 0x33b   : > { %v5443_v7 = vpop.f32.mrb[124].mxu0  ;;  %v5368_v30 = vpop.f32.mrb[125].mxu1 }
 0x33c   : > { %v5445_v40 = vpop.f32.mrb[125].mxu0 }
 0x33e   : > { %v5372_v32 = vpop.f32.mrb[126].mxu1 }
 0x33f   : > { %v6732_v11 = vadd.f32 %v5372_v32, %v5368_v30  ;;  %v5449_v18 = vpop.f32.mrb[126].mxu0  ;;  %v5374_v36 = vpop.f32.mrb[127].mxu1 }
 0x340   : > { %v6733_v5 = vadd.f32 %v5449_v18, %v5445_v40  ;;  %v6700_v2 = vsub.f32 %v5366_v59, %v5374_v36  ;;  %v5451_v43 = vpop.f32.mrb[127].mxu0 }
 0x341   : > { %v7190_v19 = vcombine.low %v6730_v21, %v6732_v11  ;;  %v7191_v42 = vcombine.high %v6730_v21, %v6732_v11  ;;  %v6701_v35 = vsub.f32 %v5443_v7, %v5451_v43 }
 0x342   : > { %v7206_v47 = vcombine.low %v6731_v51, %v6733_v5  ;;  %v7207_v3 = vcombine.high %v6731_v51, %v6733_v5  ;;  %v7054_v34 = vcombine.low %v6698_v29, %v6700_v2  ;;  %v7055_v33 = vcombine.high %v6698_v29, %v6700_v2  ;;  %v9524_v48 = vpop.f32.mrb[128].mxu1 }
 0x343   : > { %v7198_v17 = vrot.slane %v7190_v19, %v8728_v9  ;;  %v7205_v4 = vrot.slane %v7191_v42, %v8728_v9  ;;  %v7070_v63 = vcombine.low %v6699_v14, %v6701_v35  ;;  %v7071_v15 = vcombine.high %v6699_v14, %v6701_v35  ;;  %v9528_v16 = vpop.f32.mrb[128].mxu0  ;;  %v5522_v0 = vpop.f32.mrb[129].mxu1 }
 0x344   : > { %v7214_v58 = vrot.slane %v7206_v47, %v8728_v9  ;;  %v7221_v28 = vrot.slane %v7207_v3, %v8728_v9  ;;  %v7062_v10 = vrot.slane %v7054_v34, %v8728_v9  ;;  %v7069_v54 = vrot.slane %v7055_v33, %v8728_v9  ;;  %v5599_v23 = vpop.f32.mrb[129].mxu0 }
 0x345   : > { %v7078_v38 = vrot.slane %v7070_v63, %v8728_v9  ;;  %v7085_v50 = vrot.slane %v7071_v15, %v8728_v9 }
 0x346   : > { %v7254_v6 = vcombine.low %v7198_v17, %v7214_v58  ;;  %v7255_v37 = vcombine.high %v7198_v17, %v7214_v58  ;;  %v7270_v53 = vcombine.low %v7205_v4, %v7221_v28  ;;  %v7271_v46 = vcombine.high %v7205_v4, %v7221_v28  ;;  %v5526_v20 = vpop.f32.mrb[130].mxu1 }
 0x347   : > { %v7118_v24 = vcombine.low %v7062_v10, %v7078_v38  ;;  %v7119_v49 = vcombine.high %v7062_v10, %v7078_v38  ;;  %v7134_v8 = vcombine.low %v7069_v54, %v7085_v50  ;;  %v7135_v22 = vcombine.high %v7069_v54, %v7085_v50  ;;  %v5603_v26 = vpop.f32.mrb[130].mxu0  ;;  %v5528_v27 = vpop.f32.mrb[131].mxu1 }
 0x348   : > { %v7262_v55 = vrot.slane %v7254_v6, %v8738_v44  ;;  %v7269_v56 = vrot.slane %v7255_v37, %v8738_v44  ;;  %v7278_v31 = vrot.slane %v7270_v53, %v8738_v44  ;;  %v7285_v25 = vrot.slane %v7271_v46, %v8738_v44  ;;  %v5605_v39 = vpop.f32.mrb[131].mxu0 }
 0x349   : > { %v7126_v12 = vrot.slane %v7118_v24, %v8738_v44  ;;  %v7133_v57 = vrot.slane %v7119_v49, %v8738_v44  ;;  %v7142_v21 = vrot.slane %v7134_v8, %v8738_v44  ;;  %v7149_v51 = vrot.slane %v7135_v22, %v8738_v44 }
 0x34a   : > { %v7286_v29 = vcombine.low %v9507_v52, %v7262_v55  ;;  %v7287_v14 = vcombine.high %v9507_v52, %v7262_v55  ;;  %v7288_v59 = vcombine.low %v9510_v1, %v7269_v56  ;;  %v7289_v7 = vcombine.high %v9510_v1, %v7269_v56  ;;  %v5674_v30 = vpop.f32.mrb[132].mxu1 }
 0x34b   : > { %v7290_v40 = vcombine.low %v9513_v62, %v7278_v31  ;;  %v7291_v32 = vcombine.high %v9513_v62, %v7278_v31  ;;  %v7292_v11 = vcombine.low %v9516_v61, %v7285_v25  ;;  %v7293_v18 = vcombine.high %v9516_v61, %v7285_v25  ;;  %v5751_v36 = vpop.f32.mrb[132].mxu0  ;;  %v5676_v5 = vpop.f32.mrb[133].mxu1 }
 0x34c   : > { %7855 = vst [vmem:[%s9476_s11 + $0x88] sm:$0xff] %v7286_v29  ;;  %7857 = vst [vmem:[%s9476_s11 + $0x98] sm:$0xff] %v7287_v14  ;;  %v7150_v52 = vcombine.low %v9519_v41, %v7126_v12  ;;  %v7151_v1 = vcombine.high %v9519_v41, %v7126_v12  ;;  %v7152_v62 = vcombine.low %v9522_v45, %v7133_v57  ;;  %v5753_v43 = vpop.f32.mrb[133].mxu0 }
 0x34d   : > { %7859 = vst [vmem:[%s9476_s11 + $0xa8] sm:$0xff] %v7288_v59  ;;  %7861 = vst [vmem:[%s9476_s11 + $0xb8] sm:$0xff] %v7289_v7  ;;  %v7153_v2 = vcombine.high %v9522_v45, %v7133_v57  ;;  %v7154_v61 = vcombine.low %v7110_v60, %v7142_v21  ;;  %v7155_v19 = vcombine.high %v7110_v60, %v7142_v21 }
 0x34e   : > { %7863 = vst [vmem:[%s9476_s11 + $0xc8] sm:$0xff] %v7290_v40  ;;  %7865 = vst [vmem:[%s9476_s11 + $0xd8] sm:$0xff] %v7291_v32  ;;  %v7156_v42 = vcombine.low %v9536_v13, %v7149_v51  ;;  %v7157_v35 = vcombine.high %v9536_v13, %v7149_v51  ;;  %v6734_v41 = vadd.f32 %v5526_v20, %v5522_v0  ;;  %v5680_v34 = vpop.f32.mrb[134].mxu1 }
 0x34f   : > { %7867 = vst [vmem:[%s9476_s11 + $0xe8] sm:$0xff] %v7292_v11  ;;  %7869 = vst [vmem:[%s9476_s11 + $0xf8] sm:$0xff] %v7293_v18  ;;  %v6735_v45 = vadd.f32 %v5603_v26, %v5599_v23  ;;  %v6702_v47 = vsub.f32 %v9524_v48, %v5528_v27  ;;  %v6703_v3 = vsub.f32 %v9528_v16, %v5605_v39  ;;  %v5757_v17 = vpop.f32.mrb[134].mxu0  ;;  %v5682_v4 = vpop.f32.mrb[135].mxu1 }
 0x350   : > { %7854 = vst [vmem:[%s9476_s11 + $0x80] sm:$0xff] %v7150_v52  ;;  %7856 = vst [vmem:[%s9476_s11 + $0x90] sm:$0xff] %v7151_v1  ;;  %v6736_v33 = vadd.f32 %v5680_v34, %v5676_v5  ;;  %v6737_v63 = vadd.f32 %v5757_v17, %v5753_v43  ;;  %v6704_v15 = vsub.f32 %v5674_v30, %v5682_v4  ;;  %v5759_v58 = vpop.f32.mrb[135].mxu0 }
 0x351   : > { %7858 = vst [vmem:[%s9476_s11 + $0xa0] sm:$0xff] %v7152_v62  ;;  %7860 = vst [vmem:[%s9476_s11 + $0xb0] sm:$0xff] %v7153_v2  ;;  %v6705_v54 = vsub.f32 %v5751_v36, %v5759_v58 }
 0x352   : > { %7862 = vst [vmem:[%s9476_s11 + $0xc0] sm:$0xff] %v7154_v61  ;;  %7864 = vst [vmem:[%s9476_s11 + $0xd0] sm:$0xff] %v7155_v19  ;;  %v7430_v28 = vcombine.low %v6734_v41, %v6736_v33  ;;  %v7431_v10 = vcombine.high %v6734_v41, %v6736_v33  ;;  %v7446_v0 = vcombine.low %v6735_v45, %v6737_v63  ;;  %v5828_v13 = vpop.f32.mrb[136].mxu1 }
 0x353   : > { %7866 = vst [vmem:[%s9476_s11 + $0xe0] sm:$0xff] %v7156_v42  ;;  %7868 = vst [vmem:[%s9476_s11 + $0xf0] sm:$0xff] %v7157_v35  ;;  %v7447_v23 = vcombine.high %v6735_v45, %v6737_v63  ;;  %v7294_v60 = vcombine.low %v6702_v47, %v6704_v15  ;;  %v7295_v48 = vcombine.high %v6702_v47, %v6704_v15  ;;  %v5905_v37 = vpop.f32.mrb[136].mxu0  ;;  %v5830_v53 = vpop.f32.mrb[137].mxu1 }
 0x354   : > { %v7438_v16 = vrot.slane %v7430_v28, %v8728_v9  ;;  %v7445_v38 = vrot.slane %v7431_v10, %v8728_v9  ;;  %v7310_v50 = vcombine.low %v6703_v3, %v6705_v54  ;;  %v7311_v6 = vcombine.high %v6703_v3, %v6705_v54  ;;  %v5907_v8 = vpop.f32.mrb[137].mxu0 }
 0x355   : > { %v7454_v46 = vrot.slane %v7446_v0, %v8728_v9  ;;  %v7461_v20 = vrot.slane %v7447_v23, %v8728_v9  ;;  %v7302_v24 = vrot.slane %v7294_v60, %v8728_v9  ;;  %v7309_v49 = vrot.slane %v7295_v48, %v8728_v9 }
 0x356   : > { %v7318_v22 = vrot.slane %v7310_v50, %v8728_v9  ;;  %v7325_v26 = vrot.slane %v7311_v6, %v8728_v9  ;;  %v5834_v25 = vpop.f32.mrb[138].mxu1 }
 0x357   : > { %v7494_v27 = vcombine.low %v7438_v16, %v7454_v46  ;;  %v7495_v55 = vcombine.high %v7438_v16, %v7454_v46  ;;  %v7510_v56 = vcombine.low %v7445_v38, %v7461_v20  ;;  %v7511_v31 = vcombine.high %v7445_v38, %v7461_v20  ;;  %v5911_v51 = vpop.f32.mrb[138].mxu0  ;;  %v5836_v29 = vpop.f32.mrb[139].mxu1 }
 0x358   : > { %v7358_v39 = vcombine.low %v7302_v24, %v7318_v22  ;;  %v7359_v12 = vcombine.high %v7302_v24, %v7318_v22  ;;  %v7374_v57 = vcombine.low %v7309_v49, %v7325_v26  ;;  %v7375_v21 = vcombine.high %v7309_v49, %v7325_v26  ;;  %v5913_v14 = vpop.f32.mrb[139].mxu0 }
 0x359   : > { %v6738_v59 = vadd.f32 %v5834_v25, %v5830_v53  ;;  %v6739_v7 = vadd.f32 %v5911_v51, %v5907_v8  ;;  %v6706_v30 = vsub.f32 %v5828_v13, %v5836_v29  ;;  %v6707_v40 = vsub.f32 %v5905_v37, %v5913_v14 }
 0x35a   : > { %v5982_v32 = vpop.f32.mrb[140].mxu1  ;;  %v9589_v52 = vrot.slane %v7494_v27, %v8738_v44  ;;  %v9592_v1 = vrot.slane %v7495_v55, %v8738_v44  ;;  %v9595_v62 = vrot.slane %v7510_v56, %v8738_v44  ;;  %v9598_v19 = vrot.slane %v7511_v31, %v8738_v44 }
 0x35b   : > { %v6059_v11 = vpop.f32.mrb[140].mxu0  ;;  %v5984_v18 = vpop.f32.mrb[141].mxu1  ;;  %v9601_v42 = vrot.slane %v7358_v39, %v8738_v44  ;;  %v9604_v47 = vrot.slane %v7359_v12, %v8738_v44  ;;  %v7382_v6 = vrot.slane %v7374_v57, %v8738_v44  ;;  %v9618_v37 = vrot.slane %v7375_v21, %v8738_v44 }
 0x35c   : > { %v6061_v36 = vpop.f32.mrb[141].mxu0 }
 0x35e   : > { %v5988_v5 = vpop.f32.mrb[142].mxu1 }
 0x35f   : > { %v6740_v2 = vadd.f32 %v5988_v5, %v5984_v18  ;;  %v6065_v43 = vpop.f32.mrb[142].mxu0  ;;  %v5990_v61 = vpop.f32.mrb[143].mxu1 }
 0x360   : > { %v6741_v35 = vadd.f32 %v6065_v43, %v6061_v36  ;;  %v6708_v41 = vsub.f32 %v5982_v32, %v5990_v61  ;;  %v6067_v45 = vpop.f32.mrb[143].mxu0 }
 0x361   : > { %v7462_v3 = vcombine.low %v6738_v59, %v6740_v2  ;;  %v7463_v34 = vcombine.high %v6738_v59, %v6740_v2  ;;  %v6709_v33 = vsub.f32 %v6059_v11, %v6067_v45 }
 0x362   : > { %v7478_v17 = vcombine.low %v6739_v7, %v6741_v35  ;;  %v7479_v4 = vcombine.high %v6739_v7, %v6741_v35  ;;  %v7326_v63 = vcombine.low %v6706_v30, %v6708_v41  ;;  %v7327_v15 = vcombine.high %v6706_v30, %v6708_v41  ;;  %v9606_v58 = vpop.f32.mrb[144].mxu1 }
 0x363   : > { %v7470_v28 = vrot.slane %v7462_v3, %v8728_v9  ;;  %v7477_v10 = vrot.slane %v7463_v34, %v8728_v9  ;;  %v7342_v54 = vcombine.low %v6707_v40, %v6709_v33  ;;  %v7343_v0 = vcombine.high %v6707_v40, %v6709_v33  ;;  %v9610_v23 = vpop.f32.mrb[144].mxu0  ;;  %v6138_v60 = vpop.f32.mrb[145].mxu1 }
 0x364   : > { %v7486_v48 = vrot.slane %v7478_v17, %v8728_v9  ;;  %v7493_v13 = vrot.slane %v7479_v4, %v8728_v9  ;;  %v7334_v16 = vrot.slane %v7326_v63, %v8728_v9  ;;  %v7341_v38 = vrot.slane %v7327_v15, %v8728_v9  ;;  %v6215_v50 = vpop.f32.mrb[145].mxu0 }
 0x365   : > { %v7350_v53 = vrot.slane %v7342_v54, %v8728_v9  ;;  %v7357_v46 = vrot.slane %v7343_v0, %v8728_v9 }
 0x366   : > { %v7526_v20 = vcombine.low %v7470_v28, %v7486_v48  ;;  %v7527_v24 = vcombine.high %v7470_v28, %v7486_v48  ;;  %v7542_v49 = vcombine.low %v7477_v10, %v7493_v13  ;;  %v7543_v8 = vcombine.high %v7477_v10, %v7493_v13  ;;  %v6142_v22 = vpop.f32.mrb[146].mxu1 }
 0x367   : > { %v7390_v26 = vcombine.low %v7334_v16, %v7350_v53  ;;  %v7391_v27 = vcombine.high %v7334_v16, %v7350_v53  ;;  %v7406_v55 = vcombine.low %v7341_v38, %v7357_v46  ;;  %v7407_v56 = vcombine.high %v7341_v38, %v7357_v46  ;;  %v6219_v31 = vpop.f32.mrb[146].mxu0  ;;  %v6144_v25 = vpop.f32.mrb[147].mxu1 }
 0x368   : > { %v7534_v39 = vrot.slane %v7526_v20, %v8738_v44  ;;  %v7541_v12 = vrot.slane %v7527_v24, %v8738_v44  ;;  %v7550_v57 = vrot.slane %v7542_v49, %v8738_v44  ;;  %v7557_v21 = vrot.slane %v7543_v8, %v8738_v44  ;;  %v6221_v51 = vpop.f32.mrb[147].mxu0 }
 0x369   : > { %v7398_v29 = vrot.slane %v7390_v26, %v8738_v44  ;;  %v7405_v14 = vrot.slane %v7391_v27, %v8738_v44  ;;  %v7414_v59 = vrot.slane %v7406_v55, %v8738_v44  ;;  %v7421_v7 = vrot.slane %v7407_v56, %v8738_v44 }
 0x36a   : > { %v7558_v30 = vcombine.low %v9589_v52, %v7534_v39  ;;  %v7559_v40 = vcombine.high %v9589_v52, %v7534_v39  ;;  %v7560_v32 = vcombine.low %v9592_v1, %v7541_v12  ;;  %v7561_v11 = vcombine.high %v9592_v1, %v7541_v12  ;;  %v6290_v18 = vpop.f32.mrb[148].mxu1 }
 0x36b   : > { %v7562_v36 = vcombine.low %v9595_v62, %v7550_v57  ;;  %v7563_v5 = vcombine.high %v9595_v62, %v7550_v57  ;;  %v7564_v2 = vcombine.low %v9598_v19, %v7557_v21  ;;  %v7565_v43 = vcombine.high %v9598_v19, %v7557_v21  ;;  %v6367_v61 = vpop.f32.mrb[148].mxu0  ;;  %v6292_v35 = vpop.f32.mrb[149].mxu1 }
 0x36c   : > { %7871 = vst [vmem:[%s9476_s11 + $0x108] sm:$0xff] %v7558_v30  ;;  %7873 = vst [vmem:[%s9476_s11 + $0x118] sm:$0xff] %v7559_v40  ;;  %v7422_v52 = vcombine.low %v9601_v42, %v7398_v29  ;;  %v7423_v1 = vcombine.high %v9601_v42, %v7398_v29  ;;  %v7424_v62 = vcombine.low %v9604_v47, %v7405_v14  ;;  %v6369_v45 = vpop.f32.mrb[149].mxu0 }
 0x36d   : > { %7875 = vst [vmem:[%s9476_s11 + $0x128] sm:$0xff] %v7560_v32  ;;  %7877 = vst [vmem:[%s9476_s11 + $0x138] sm:$0xff] %v7561_v11  ;;  %v7425_v41 = vcombine.high %v9604_v47, %v7405_v14  ;;  %v7426_v19 = vcombine.low %v7382_v6, %v7414_v59  ;;  %v7427_v3 = vcombine.high %v7382_v6, %v7414_v59 }
 0x36e   : > { %7879 = vst [vmem:[%s9476_s11 + $0x148] sm:$0xff] %v7562_v36  ;;  %7881 = vst [vmem:[%s9476_s11 + $0x158] sm:$0xff] %v7563_v5  ;;  %v7428_v34 = vcombine.low %v9618_v37, %v7421_v7  ;;  %v7429_v33 = vcombine.high %v9618_v37, %v7421_v7  ;;  %v6742_v42 = vadd.f32 %v6142_v22, %v6138_v60  ;;  %v6296_v63 = vpop.f32.mrb[150].mxu1 }
 0x36f   : > { %7883 = vst [vmem:[%s9476_s11 + $0x168] sm:$0xff] %v7564_v2  ;;  %7885 = vst [vmem:[%s9476_s11 + $0x178] sm:$0xff] %v7565_v43  ;;  %v6743_v47 = vadd.f32 %v6219_v31, %v6215_v50  ;;  %v6710_v17 = vsub.f32 %v9606_v58, %v6144_v25  ;;  %v6711_v4 = vsub.f32 %v9610_v23, %v6221_v51  ;;  %v6373_v28 = vpop.f32.mrb[150].mxu0  ;;  %v6298_v10 = vpop.f32.mrb[151].mxu1 }
 0x370   : > { %7870 = vst [vmem:[%s9476_s11 + $0x100] sm:$0xff] %v7422_v52  ;;  %7872 = vst [vmem:[%s9476_s11 + $0x110] sm:$0xff] %v7423_v1  ;;  %v6744_v15 = vadd.f32 %v6296_v63, %v6292_v35  ;;  %v6745_v54 = vadd.f32 %v6373_v28, %v6369_v45  ;;  %v6712_v0 = vsub.f32 %v6290_v18, %v6298_v10  ;;  %v6375_v48 = vpop.f32.mrb[151].mxu0 }
 0x371   : > { %7874 = vst [vmem:[%s9476_s11 + $0x120] sm:$0xff] %v7424_v62  ;;  %7876 = vst [vmem:[%s9476_s11 + $0x130] sm:$0xff] %v7425_v41  ;;  %v6713_v38 = vsub.f32 %v6367_v61, %v6375_v48 }
 0x372   : > { %7878 = vst [vmem:[%s9476_s11 + $0x140] sm:$0xff] %v7426_v19  ;;  %7880 = vst [vmem:[%s9476_s11 + $0x150] sm:$0xff] %v7427_v3  ;;  %v7702_v13 = vcombine.low %v6742_v42, %v6744_v15  ;;  %v7703_v16 = vcombine.high %v6742_v42, %v6744_v15  ;;  %v7718_v60 = vcombine.low %v6743_v47, %v6745_v54  ;;  %v6444_v37 = vpop.f32.mrb[152].mxu1 }
 0x373   : > { %7882 = vst [vmem:[%s9476_s11 + $0x160] sm:$0xff] %v7428_v34  ;;  %7884 = vst [vmem:[%s9476_s11 + $0x170] sm:$0xff] %v7429_v33  ;;  %v7719_v50 = vcombine.high %v6743_v47, %v6745_v54  ;;  %v7566_v6 = vcombine.low %v6710_v17, %v6712_v0  ;;  %v7567_v58 = vcombine.high %v6710_v17, %v6712_v0  ;;  %v6521_v24 = vpop.f32.mrb[152].mxu0  ;;  %v6446_v49 = vpop.f32.mrb[153].mxu1 }
 0x374   : > { %v7710_v23 = vrot.slane %v7702_v13, %v8728_v9  ;;  %v7717_v53 = vrot.slane %v7703_v16, %v8728_v9  ;;  %v7582_v46 = vcombine.low %v6711_v4, %v6713_v38  ;;  %v7583_v20 = vcombine.high %v6711_v4, %v6713_v38  ;;  %v6523_v55 = vpop.f32.mrb[153].mxu0 }
 0x375   : > { %v7726_v8 = vrot.slane %v7718_v60, %v8728_v9  ;;  %v7733_v22 = vrot.slane %v7719_v50, %v8728_v9  ;;  %v7574_v26 = vrot.slane %v7566_v6, %v8728_v9  ;;  %v7581_v27 = vrot.slane %v7567_v58, %v8728_v9 }
 0x376   : > { %v7590_v56 = vrot.slane %v7582_v46, %v8728_v9  ;;  %v7597_v31 = vrot.slane %v7583_v20, %v8728_v9  ;;  %v6450_v21 = vpop.f32.mrb[154].mxu1 }
 0x377   : > { %v7766_v25 = vcombine.low %v7710_v23, %v7726_v8  ;;  %v7767_v39 = vcombine.high %v7710_v23, %v7726_v8  ;;  %v7782_v12 = vcombine.low %v7717_v53, %v7733_v22  ;;  %v7783_v57 = vcombine.high %v7717_v53, %v7733_v22  ;;  %v6527_v7 = vpop.f32.mrb[154].mxu0  ;;  %v6452_v30 = vpop.f32.mrb[155].mxu1 }
 0x378   : > { %v7630_v51 = vcombine.low %v7574_v26, %v7590_v56  ;;  %v7631_v29 = vcombine.high %v7574_v26, %v7590_v56  ;;  %v7646_v14 = vcombine.low %v7581_v27, %v7597_v31  ;;  %v7647_v59 = vcombine.high %v7581_v27, %v7597_v31  ;;  %v6529_v40 = vpop.f32.mrb[155].mxu0 }
 0x379   : > { %v6746_v32 = vadd.f32 %v6450_v21, %v6446_v49  ;;  %v6747_v11 = vadd.f32 %v6527_v7, %v6523_v55  ;;  %v6714_v18 = vsub.f32 %v6444_v37, %v6452_v30  ;;  %v6715_v36 = vsub.f32 %v6521_v24, %v6529_v40 }
 0x37a   : > { %v6598_v5 = vpop.f32.mrb[156].mxu1  ;;  %v7774_v52 = vrot.slane %v7766_v25, %v8738_v44  ;;  %v7781_v1 = vrot.slane %v7767_v39, %v8738_v44  ;;  %v9673_v62 = vrot.slane %v7782_v12, %v8738_v44  ;;  %v9676_v3 = vrot.slane %v7783_v57, %v8738_v44 }
 0x37b   : > { %v6675_v2 = vpop.f32.mrb[156].mxu0  ;;  %v6600_v43 = vpop.f32.mrb[157].mxu1  ;;  %v9679_v34 = vrot.slane %v7630_v51, %v8738_v44  ;;  %v9682_v17 = vrot.slane %v7631_v29, %v8738_v44  ;;  %v7654_v37 = vrot.slane %v7646_v14, %v8738_v44  ;;  %v7661_v23 = vrot.slane %v7647_v59, %v8738_v44 }
 0x37c   : > { %v6677_v61 = vpop.f32.mrb[157].mxu0 }
 0x37e   : > { %v6604_v35 = vpop.f32.mrb[158].mxu1 }
 0x37f   : > { %v6748_v41 = vadd.f32 %v6604_v35, %v6600_v43  ;;  %v6681_v45 = vpop.f32.mrb[158].mxu0  ;;  %v6606_v19 = vpop.f32.mrb[159].mxu1 }
 0x380   : > { %v6749_v33 = vadd.f32 %v6681_v45, %v6677_v61  ;;  %v6716_v42 = vsub.f32 %v6598_v5, %v6606_v19  ;;  %v6683_v47 = vpop.f32.mrb[159].mxu0 }
 0x381   : > { %v7734_v4 = vcombine.low %v6746_v32, %v6748_v41  ;;  %v7735_v63 = vcombine.high %v6746_v32, %v6748_v41  ;;  %v6717_v15 = vsub.f32 %v6675_v2, %v6683_v47 }
 0x382   : > { %v7750_v28 = vcombine.low %v6747_v11, %v6749_v33  ;;  %v7751_v10 = vcombine.high %v6747_v11, %v6749_v33  ;;  %v7598_v54 = vcombine.low %v6714_v18, %v6716_v42  ;;  %v7599_v0 = vcombine.high %v6714_v18, %v6716_v42 }
 0x383   : > { %v7742_v48 = vrot.slane %v7734_v4, %v8728_v9  ;;  %v7749_v13 = vrot.slane %v7735_v63, %v8728_v9  ;;  %v7614_v16 = vcombine.low %v6715_v36, %v6717_v15  ;;  %v7615_v38 = vcombine.high %v6715_v36, %v6717_v15 }
 0x384   : > { %v7758_v60 = vrot.slane %v7750_v28, %v8728_v9  ;;  %v7765_v50 = vrot.slane %v7751_v10, %v8728_v9  ;;  %v7606_v6 = vrot.slane %v7598_v54, %v8728_v9  ;;  %v7613_v58 = vrot.slane %v7599_v0, %v8728_v9 }
 0x385   : > { %v7622_v53 = vrot.slane %v7614_v16, %v8728_v9  ;;  %v7629_v46 = vrot.slane %v7615_v38, %v8728_v9 }
 0x386   : > { %v7798_v20 = vcombine.low %v7742_v48, %v7758_v60  ;;  %v7799_v24 = vcombine.high %v7742_v48, %v7758_v60  ;;  %v7814_v49 = vcombine.low %v7749_v13, %v7765_v50  ;;  %v7815_v8 = vcombine.high %v7749_v13, %v7765_v50 }
 0x387   : > { %v7662_v22 = vcombine.low %v7606_v6, %v7622_v53  ;;  %v7663_v26 = vcombine.high %v7606_v6, %v7622_v53  ;;  %v7678_v27 = vcombine.low %v7613_v58, %v7629_v46  ;;  %v7679_v55 = vcombine.high %v7613_v58, %v7629_v46 }
 0x388   : > { %v7806_v56 = vrot.slane %v7798_v20, %v8738_v44  ;;  %v7813_v31 = vrot.slane %v7799_v24, %v8738_v44  ;;  %v7822_v25 = vrot.slane %v7814_v49, %v8738_v44  ;;  %v7829_v39 = vrot.slane %v7815_v8, %v8738_v44 }
 0x389   : > { %v7670_v9 = vrot.slane %v7662_v22, %v8738_v44  ;;  %v7677_v12 = vrot.slane %v7663_v26, %v8738_v44  ;;  %v7686_v57 = vrot.slane %v7678_v27, %v8738_v44  ;;  %v7693_v21 = vrot.slane %v7679_v55, %v8738_v44 }
 0x38a   : > { %v7830_v51 = vcombine.low %v7774_v52, %v7806_v56  ;;  %v7831_v29 = vcombine.high %v7774_v52, %v7806_v56  ;;  %v7832_v14 = vcombine.low %v7781_v1, %v7813_v31  ;;  %v7833_v59 = vcombine.high %v7781_v1, %v7813_v31 }
 0x38b   : > { %v7834_v7 = vcombine.low %v9673_v62, %v7822_v25  ;;  %v7835_v30 = vcombine.high %v9673_v62, %v7822_v25  ;;  %v7836_v40 = vcombine.low %v9676_v3, %v7829_v39  ;;  %v7837_v32 = vcombine.high %v9676_v3, %v7829_v39 }
 0x38c   : > { %7887 = vst [vmem:[%s9476_s11 + $0x188] sm:$0xff] %v7830_v51  ;;  %7889 = vst [vmem:[%s9476_s11 + $0x198] sm:$0xff] %v7831_v29  ;;  %v7694_v44 = vcombine.low %v9679_v34, %v7670_v9  ;;  %v7695_v11 = vcombine.high %v9679_v34, %v7670_v9  ;;  %v7696_v18 = vcombine.low %v9682_v17, %v7677_v12 }
 0x38d   : > { %7891 = vst [vmem:[%s9476_s11 + $0x1a8] sm:$0xff] %v7832_v14  ;;  %7893 = vst [vmem:[%s9476_s11 + $0x1b8] sm:$0xff] %v7833_v59  ;;  %v7697_v36 = vcombine.high %v9682_v17, %v7677_v12  ;;  %v7698_v5 = vcombine.low %v7654_v37, %v7686_v57  ;;  %v7699_v2 = vcombine.high %v7654_v37, %v7686_v57 }
 0x38e   : > { %7895 = vst [vmem:[%s9476_s11 + $0x1c8] sm:$0xff] %v7834_v7  ;;  %7897 = vst [vmem:[%s9476_s11 + $0x1d8] sm:$0xff] %v7835_v30  ;;  %v7700_v43 = vcombine.low %v7661_v23, %v7693_v21  ;;  %v7701_v61 = vcombine.high %v7661_v23, %v7693_v21 }
 0x38f   : > { %7899 = vst [vmem:[%s9476_s11 + $0x1e8] sm:$0xff] %v7836_v40  ;;  %7901 = vst [vmem:[%s9476_s11 + $0x1f8] sm:$0xff] %v7837_v32 }
 0x390   : > { %7886 = vst [vmem:[%s9476_s11 + $0x180] sm:$0xff] %v7694_v44  ;;  %7888 = vst [vmem:[%s9476_s11 + $0x190] sm:$0xff] %v7695_v11 }
 0x391   : > { %7890 = vst [vmem:[%s9476_s11 + $0x1a0] sm:$0xff] %v7696_v18  ;;  %7892 = vst [vmem:[%s9476_s11 + $0x1b0] sm:$0xff] %v7697_v36 }
 0x392   : > { %7894 = vst [vmem:[%s9476_s11 + $0x1c0] sm:$0xff] %v7698_v5  ;;  %7896 = vst [vmem:[%s9476_s11 + $0x1d0] sm:$0xff] %v7699_v2 }
 0x393   : > { %7898 = vst [vmem:[%s9476_s11 + $0x1e0] sm:$0xff] %v7700_v43  ;;  %7900 = vst [vmem:[%s9476_s11 + $0x1f0] sm:$0xff] %v7701_v61 }
 0x394   : > { %8217 = shalt.err (!%p8214_p3)
}
 0x395   : > { %s8218_s30 = scalar_lea.hbm %s9719_s20, 8192  ;;  %s8222_s7 = scalar_lea.hbm %s9782_s4, 16384 }
 0x396   : > { %p8219_p4 = scmp.ne.s32.totalorder %s9719_s20, %s8218_s30  ;;  %p8223_p9 = scmp.lt.u32.totalorder %s9719_s20, %s9782_s4 }
 0x397   : > { %p8224_p10 = scmp.lt.u32.totalorder %s8222_s7, %s8218_s30  ;;  %p8226_p12 = scmp.lt.u32.totalorder %s8218_s30, %s9719_s20 }
 0x398   : > { %p8220_p7 = pnand %p8219_p4, %p8337_p5 }
 0x399   : > { %p8225_p11 = por %p8224_p10, %p8223_p9 }
 0x39a   : > { %p8221_p8 = pneg %p8220_p7 }
 0x39b   : > { %p8227_p13 = por %p8226_p12, %p8225_p11 }
 0x39d   : > { %p8228_p0 = pnand %p8227_p13, %p8221_p8 }
 0x39f   : > { %8231 = shalt.err (!%p8228_p0)
}
 0x3a0   : > { %s8272_s10 = smov 256   ;;  %s8273_s11 = smov 16  }
 0x3a1   : > { %8158 = dma.vmem_to_hbm [thread:$0]  (%p8337_p5), %s9721_s13, 8192, %s9719_s20, %s9737_s22, %s8272_s10, %s8272_s10, %s8273_s11  }
 0x3a2 PF: > { %p8164_p1 = scmp.ge.s32.totalorder %s8266_s18, 2  ;;  %s7932_s12 = sand.u32 1, %s8254_s15  }
 0x3a3   : > { %s7933_s19 = scalar_lea.sflag [#allocation3], %s7932_s12 }
 0x3a4   : > { %p8161_p2 = pnand %p8164_p1, %p8341_p6 }
 0x3a6   : > { %8249 = dma.done.wait (!%p8161_p2), %s7933_s19, 8192  }
 0x3a7   : > { %8251 = vsyncadd (!%p8161_p2), %s7933_s19, 4294959104  ;;  %p14_p3 = scmp.ge.s32.totalorder %s8324_s21, 4   ;;  %s9789_s15 = smov %s8258_s16 }
 0x3a8   : > { %s9790_s16 = smov %s8262_s17  ;;  %s9791_s17 = smov %s8335_s24 }
 0x3a9   : > { %s9792_s18 = smov %s8324_s21  ;;  %16 = sbr.rel (!%p14_p3) target bundleno = 3 (0x3), region = 71 }
 0x3b0   :  { %7938 = vsyncpa [#allocation3], 1 }
 0x3b1   :  { %7940 = vsyncpa [#allocation3 + $0x1], 1 }

</bundles_post_ra>
